<compile_context>
chip_gen: v7x
topology: tpu7x:2x2x1
jax: 0.10.0
libtpu: 0.0.40
codegen_flags: <defaults>
</compile_context>

<pallas_src>
import functools
import math

import jax
import jax.numpy as jnp
from jax import lax
from jax.experimental import pallas as pl
from jax.experimental.pallas import tpu as pltpu

# Matmul operand dtype (f32 accumulation everywhere). Set to jnp.float32 for
# exact parity with the f32 PyTorch reference.
MM_DTYPE = jnp.bfloat16


# ----------------------------------------------------------------------------
# Kernel 1/2: fused attention block
#   out = x + W_o( DiffAttn( LN(x), kv ) )           (kv = encoder_out or LN(x))
# ----------------------------------------------------------------------------
def _attn_block_kernel(x_ref, kv_ref, lam_ref, g_ref, b_ref,
                       wq_ref, wk_ref, wv_ref, wo_ref, subw_ref, o_ref,
                       *, H, d, scaling, lam_init, eps, self_attn, mm_dtype):
    x = x_ref[0].astype(jnp.float32)                       # (Tq, D) raw residual

    # --- LayerNorm (f32 stats) ---------------------------------------------
    mu = jnp.mean(x, axis=-1, keepdims=True)
    xc = x - mu
    var = jnp.mean(xc * xc, axis=-1, keepdims=True)
    xn = xc * lax.rsqrt(var + eps) * g_ref[...] + b_ref[...]   # (Tq, D)

    # k/v source: normalized x for self-attention, raw encoder_out for cross.
    kvn = xn if self_attn else kv_ref[0].astype(jnp.float32)   # (Tk, D)

    # --- Q/K/V projections (bf16 operands, f32 accumulation) ----------------
    xm = xn.astype(mm_dtype)
    kvm = kvn.astype(mm_dtype)
    q = jnp.dot(xm, wq_ref[...].astype(mm_dtype),
                preferred_element_type=jnp.float32) * scaling      # (Tq, D)
    k = jnp.dot(kvm, wk_ref[...].astype(mm_dtype),
                preferred_element_type=jnp.float32)                # (Tk, D)
    v = jnp.dot(kvm, wv_ref[...].astype(mm_dtype),
                preferred_element_type=jnp.float32)                # (Tk, D)
    qm = q.astype(mm_dtype)
    km = k.astype(mm_dtype)
    vm = v.astype(mm_dtype)

    lam_full = lam_ref[0]                                  # SMEM scalar
    dn = (((1,), (1,)), ((), ()))                          # (Tq,d)·(Tk,d)->(Tq,Tk)

    def _softmax(s):                                       # f32, EUP recip
        m = jnp.max(s, axis=-1, keepdims=True)
        e = jnp.exp(s - m)
        return e * pl.reciprocal(jnp.sum(e, axis=-1, keepdims=True), approx=True)

    # All heads inside one grid step (static unroll; head columns are
    # contiguous lane slices, output re-assembled as a lane-dense (Tq, D) slab).
    heads = []
    for hh in range(H):
        q1 = qm[:, (2 * hh) * d:(2 * hh + 1) * d]
        q2 = qm[:, (2 * hh + 1) * d:(2 * hh + 2) * d]
        k1 = km[:, (2 * hh) * d:(2 * hh + 1) * d]
        k2 = km[:, (2 * hh + 1) * d:(2 * hh + 2) * d]
        vh = vm[:, hh * 2 * d:(hh + 1) * 2 * d]
        s1 = lax.dot_general(q1, k1, dn, preferred_element_type=jnp.float32)
        s2 = lax.dot_general(q2, k2, dn, preferred_element_type=jnp.float32)
        w = _softmax(s1) - lam_full * _softmax(s2)                 # (Tq, Tk)
        ah = jnp.dot(w.astype(mm_dtype), vh,
                     preferred_element_type=jnp.float32)           # (Tq, 2d)
        # per-head RMSNorm sublayer (subln), f32
        ms = jnp.mean(ah * ah, axis=-1, keepdims=True)
        heads.append(ah * lax.rsqrt(ms + eps) * subw_ref[...])
    attn = jnp.concatenate(heads, axis=-1) * (1.0 - lam_init)      # (Tq, D)

    out = jnp.dot(attn.astype(mm_dtype), wo_ref[...].astype(mm_dtype),
                  preferred_element_type=jnp.float32)              # (Tq, D)
    o_ref[0] = (x + out).astype(o_ref.dtype)               # fused residual add


def attention_block(x, kv, lam_full, ln_g, ln_b, wq, wk, wv, wo, sub_w,
                    *, num_heads, lam_init, self_attn):
    """x: (B, Tq, D) residual/query source; kv: (B, Tk, D) key/value source."""
    B, Tq, D = x.shape
    Tk = kv.shape[1]
    H = num_heads
    d = D // H // 2
    scaling = d ** -0.5
    kern = functools.partial(
        _attn_block_kernel, H=H, d=d, scaling=scaling, lam_init=lam_init,
        eps=1e-5, self_attn=self_attn, mm_dtype=MM_DTYPE)
    return pl.pallas_call(
        kern,
        out_shape=jax.ShapeDtypeStruct((B, Tq, D), x.dtype),
        grid=(B,),
        in_specs=[
            pl.BlockSpec((1, Tq, D), lambda b: (b, 0, 0)),
            pl.BlockSpec((1, Tk, D), lambda b: (b, 0, 0)),
            pl.BlockSpec(memory_space=pltpu.MemorySpace.SMEM),   # lambda_full
            pl.BlockSpec((1, D), lambda b: (0, 0)),
            pl.BlockSpec((1, D), lambda b: (0, 0)),
            pl.BlockSpec((D, D), lambda b: (0, 0)),
            pl.BlockSpec((D, D), lambda b: (0, 0)),
            pl.BlockSpec((D, D), lambda b: (0, 0)),
            pl.BlockSpec((D, D), lambda b: (0, 0)),
            pl.BlockSpec((1, 2 * d), lambda b: (0, 0)),
        ],
        out_specs=pl.BlockSpec((1, Tq, D), lambda b: (b, 0, 0)),
        compiler_params=pltpu.CompilerParams(dimension_semantics=("parallel",)),
    )(x, kv, lam_full.reshape(1).astype(jnp.float32),
      ln_g.reshape(1, D), ln_b.reshape(1, D), wq, wk, wv, wo,
      sub_w.reshape(1, 2 * d))


# ----------------------------------------------------------------------------
# Kernel 3: fused feed-forward block
#   out = x + W2( GELU( LN(x) @ W1 + b1 ) ) + b2
# Grid: (row tiles "parallel", 4D-hidden tiles "arbitrary" with accumulator).
# ----------------------------------------------------------------------------
def _ffn_kernel(x_ref, g_ref, b_ref, w1_ref, b1_ref, w2_ref, b2_ref,
                o_ref, acc_ref, *, eps, mm_dtype):
    j = pl.program_id(1)
    x = x_ref[...].astype(jnp.float32)                     # (tm, D) raw residual

    # LayerNorm (f32) -- recomputed per hidden tile; cheap vs. matmuls.
    mu = jnp.mean(x, axis=-1, keepdims=True)
    xc = x - mu
    var = jnp.mean(xc * xc, axis=-1, keepdims=True)
    xn = xc * lax.rsqrt(var + eps) * g_ref[...] + b_ref[...]

    h = jnp.dot(xn.astype(mm_dtype), w1_ref[...].astype(mm_dtype),
                preferred_element_type=jnp.float32) + b1_ref[...]   # (tm, th)
    # exact GELU (PyTorch nn.GELU default), f32
    h = 0.5 * h * (1.0 + lax.erf(h * (1.0 / math.sqrt(2.0))))
    part = jnp.dot(h.astype(mm_dtype), w2_ref[...].astype(mm_dtype),
                   preferred_element_type=jnp.float32)              # (tm, D)

    @pl.when(j == 0)
    def _():
        acc_ref[...] = x + b2_ref[...]        # residual + output bias
    acc_ref[...] += part

    @pl.when(j == pl.num_programs(1) - 1)
    def _():
        o_ref[...] = acc_ref[...].astype(o_ref.dtype)


def _pick_tile(n, candidates):
    for t in candidates:                      # prefer >= 2 grid steps
        if n % t == 0 and n // t >= 2:
            return t
    for t in candidates:
        if n % t == 0:
            return t
    return n


def ffn_block(x, ln_g, ln_b, w1, b1, w2, b2):
    B, N, D = x.shape
    M = B * N
    Hf = w1.shape[1]
    x2 = x.reshape(M, D)
    tm = _pick_tile(M, (256, 128, 64, 32, 16, 8))
    th = _pick_tile(Hf, (512, 256, 128))
    kern = functools.partial(_ffn_kernel, eps=1e-5, mm_dtype=MM_DTYPE)
    out = pl.pallas_call(
        kern,
        out_shape=jax.ShapeDtypeStruct((M, D), x.dtype),
        grid=(M // tm, Hf // th),
        in_specs=[
            pl.BlockSpec((tm, D), lambda i, j: (i, 0)),
            pl.BlockSpec((1, D), lambda i, j: (0, 0)),
            pl.BlockSpec((1, D), lambda i, j: (0, 0)),
            pl.BlockSpec((D, th), lambda i, j: (0, j)),
            pl.BlockSpec((1, th), lambda i, j: (0, j)),
            pl.BlockSpec((th, D), lambda i, j: (j, 0)),
            pl.BlockSpec((1, D), lambda i, j: (0, 0)),
        ],
        out_specs=pl.BlockSpec((tm, D), lambda i, j: (i, 0)),
        scratch_shapes=[pltpu.VMEM((tm, D), jnp.float32)],
        compiler_params=pltpu.CompilerParams(
            dimension_semantics=("parallel", "arbitrary")),
    )(x2, ln_g.reshape(1, D), ln_b.reshape(1, D), w1, b1.reshape(1, Hf),
      w2, b2.reshape(1, D))
    return out.reshape(B, N, D)


# ----------------------------------------------------------------------------
# Module glue (jit-safe; no host syncs, no HBM transposes)
# ----------------------------------------------------------------------------
def lambda_init_fn(depth):
    return 0.8 - 0.6 * math.exp(-0.3 * depth)


def _lambda_full(p, lam_init):
    # computed with jnp (works under jax.jit), passed to the kernel via SMEM
    return (jnp.exp(jnp.dot(p["lq1"], p["lk1"]))
            - jnp.exp(jnp.dot(p["lq2"], p["lk2"])) + lam_init)


def multihead_diff2_block(p, x, kv, ln_g, ln_b, *, num_heads, depth, self_attn):
    lam_init = lambda_init_fn(depth)
    lam_full = _lambda_full(p, lam_init)
    return attention_block(x, kv, lam_full, ln_g, ln_b,
                           p["wq"], p["wk"], p["wv"], p["wo"], p["sub_w"],
                           num_heads=num_heads, lam_init=lam_init,
                           self_attn=self_attn)


def custom_decoder_layer(params, x, encoder_output, num_heads, depth):
    # cross-attention block (LN1 + attn + out-proj + residual fused)
    x = multihead_diff2_block(params["cross"], x, encoder_output,
                              params["ln1_g"], params["ln1_b"],
                              num_heads=num_heads, depth=depth, self_attn=False)
    # self-attention block (LN2 + attn + out-proj + residual fused)
    x = multihead_diff2_block(params["self"], x, x,
                              params["ln2_g"], params["ln2_b"],
                              num_heads=num_heads, depth=depth, self_attn=True)
    # feed-forward block (LN3 + FFN + residual fused)
    x = ffn_block(x, params["ln3_g"], params["ln3_b"],
                  params["ff_w1"], params["ff_b1"],
                  params["ff_w2"], params["ff_b2"])
    return x


# ----------------------------------------------------------------------------
# Deterministic parameter init
# ----------------------------------------------------------------------------
def make_attn_params(key, D, H):
    d = D // H // 2
    ks = jax.random.split(key, 8)
    std = 0.02
    return {
        "wq": jax.random.normal(ks[0], (D, D), jnp.float32) * std,
        "wk": jax.random.normal(ks[1], (D, D), jnp.float32) * std,
        "wv": jax.random.normal(ks[2], (D, D), jnp.float32) * std,
        "wo": jax.random.normal(ks[3], (D, D), jnp.float32) * std,
        "lq1": jax.random.normal(ks[4], (d,), jnp.float32) * 0.1,
        "lk1": jax.random.normal(ks[5], (d,), jnp.float32) * 0.1,
        "lq2": jax.random.normal(ks[6], (d,), jnp.float32) * 0.1,
        "lk2": jax.random.normal(ks[7], (d,), jnp.float32) * 0.1,
        "sub_w": jnp.ones((2 * d,), jnp.float32),   # RMSNorm (subln) weight
    }


def make_params(key, D, H):
    kc, ks, kf1, kf2 = jax.random.split(key, 4)
    std = 0.02
    return {
        "cross": make_attn_params(kc, D, H),
        "self": make_attn_params(ks, D, H),
        "ff_w1": jax.random.normal(kf1, (D, 4 * D), jnp.float32) * std,
        "ff_b1": jnp.zeros((4 * D,), jnp.float32),
        "ff_w2": jax.random.normal(kf2, (4 * D, D), jnp.float32) * std,
        "ff_b2": jnp.zeros((D,), jnp.float32),
        "ln1_g": jnp.ones((D,), jnp.float32), "ln1_b": jnp.zeros((D,), jnp.float32),
        "ln2_g": jnp.ones((D,), jnp.float32), "ln2_b": jnp.zeros((D,), jnp.float32),
        "ln3_g": jnp.ones((D,), jnp.float32), "ln3_b": jnp.zeros((D,), jnp.float32),
    }


# ----------------------------------------------------------------------------
if __name__ == "__main__":
    B = 2          # batch
    N = 8          # num_selected_stocks
    S = 16         # encoder seq length
    D = 32         # hidden_dim
    H = 2          # num_heads  (head_dim = D // H // 2 = 8)
    DEPTH = 1

    key = jax.random.PRNGKey(0)
    kp, kx, ke = jax.random.split(key, 3)
    params = make_params(kp, D, H)
    x = jax.random.normal(kx, (B, N, D), jnp.float32)
    encoder_output = jax.random.normal(ke, (B, S, D), jnp.float32)

    layer = jax.jit(functools.partial(custom_decoder_layer,
                                      num_heads=H, depth=DEPTH))
    out = jax.block_until_ready(layer(params, x, encoder_output))
    assert out.shape == (B, N, D)
    assert bool(jnp.all(jnp.isfinite(out)))
    print("KERNEL_OK")
</pallas_src>

<mosaic_0001>
module attributes {stable_mosaic.version = 11 : i64} {
  func.func @_attn_block_kernel(%arg0: i32, %arg1: memref<1x8x32xf32, #tpu.memory_space<vmem>>, %arg2: memref<1x8x32xf32, #tpu.memory_space<vmem>>, %arg3: memref<1xf32, #tpu.memory_space<smem>>, %arg4: memref<1x32xf32, #tpu.memory_space<vmem>>, %arg5: memref<1x32xf32, #tpu.memory_space<vmem>>, %arg6: memref<32x32xf32, #tpu.memory_space<vmem>>, %arg7: memref<32x32xf32, #tpu.memory_space<vmem>>, %arg8: memref<32x32xf32, #tpu.memory_space<vmem>>, %arg9: memref<32x32xf32, #tpu.memory_space<vmem>>, %arg10: memref<1x16xf32, #tpu.memory_space<vmem>>, %arg11: memref<1x8x32xf32, #tpu.memory_space<vmem>>) attributes {dimension_semantics = [#tpu.dimension_semantics<parallel>], iteration_bounds = array<i64: 2>, scalar_prefetch = 0 : i64, scratch_operands = 0 : i64, tpu.core_type = #tpu.core_type<tc>, window_params = [{transform_indices = @transform_0, window_bounds = array<i64: 1, 8, 32>}, {transform_indices = @transform_1, window_bounds = array<i64: 1, 8, 32>}, {transform_indices = @transform_2, window_bounds = array<i64: 1>}, {pipeline_mode = #tpu.pipeline_mode<synchronous>, transform_indices = @transform_3, window_bounds = array<i64: 1, 32>}, {pipeline_mode = #tpu.pipeline_mode<synchronous>, transform_indices = @transform_4, window_bounds = array<i64: 1, 32>}, {pipeline_mode = #tpu.pipeline_mode<synchronous>, transform_indices = @transform_5, window_bounds = array<i64: 32, 32>}, {pipeline_mode = #tpu.pipeline_mode<synchronous>, transform_indices = @transform_6, window_bounds = array<i64: 32, 32>}, {pipeline_mode = #tpu.pipeline_mode<synchronous>, transform_indices = @transform_7, window_bounds = array<i64: 32, 32>}, {pipeline_mode = #tpu.pipeline_mode<synchronous>, transform_indices = @transform_8, window_bounds = array<i64: 32, 32>}, {pipeline_mode = #tpu.pipeline_mode<synchronous>, transform_indices = @transform_9, window_bounds = array<i64: 1, 16>}, {transform_indices = @transform_10, window_bounds = array<i64: 1, 8, 32>}]} {
    %c0 = arith.constant 0 : index
    %c0_0 = arith.constant 0 : index
    %c0_1 = arith.constant 0 : index
    %0 = vector.load %arg1[%c0, %c0_0, %c0_1] : memref<1x8x32xf32, #tpu.memory_space<vmem>>, vector<1x8x32xf32>
    %1 = vector.shape_cast %0 : vector<1x8x32xf32> to vector<8x32xf32>
    %cst = arith.constant dense<0.000000e+00> : vector<8xf32>
    %2 = vector.multi_reduction <add>, %1, %cst [1] : vector<8x32xf32> to vector<8xf32>
    %3 = vector.shape_cast %2 : vector<8xf32> to vector<8x1xf32>
    %cst_2 = arith.constant 3.200000e+01 : f32
    %4 = vector.broadcast %cst_2 : f32 to vector<8x1xf32>
    %5 = arith.divf %3, %4 : vector<8x1xf32>
    %6 = vector.broadcast %5 : vector<8x1xf32> to vector<8x32xf32>
    %7 = arith.subf %1, %6 : vector<8x32xf32>
    %8 = arith.mulf %7, %7 : vector<8x32xf32>
    %cst_3 = arith.constant dense<0.000000e+00> : vector<8xf32>
    %9 = vector.multi_reduction <add>, %8, %cst_3 [1] : vector<8x32xf32> to vector<8xf32>
    %10 = vector.shape_cast %9 : vector<8xf32> to vector<8x1xf32>
    %cst_4 = arith.constant 3.200000e+01 : f32
    %11 = vector.broadcast %cst_4 : f32 to vector<8x1xf32>
    %12 = arith.divf %10, %11 : vector<8x1xf32>
    %cst_5 = arith.constant 9.99999974E-6 : f32
    %13 = vector.broadcast %cst_5 : f32 to vector<8x1xf32>
    %14 = arith.addf %12, %13 : vector<8x1xf32>
    %15 = math.rsqrt %14 : vector<8x1xf32>
    %16 = vector.broadcast %15 : vector<8x1xf32> to vector<8x32xf32>
    %17 = arith.mulf %7, %16 : vector<8x32xf32>
    %c0_6 = arith.constant 0 : index
    %c0_7 = arith.constant 0 : index
    %18 = vector.load %arg4[%c0_6, %c0_7] : memref<1x32xf32, #tpu.memory_space<vmem>>, vector<1x32xf32>
    %19 = vector.broadcast %18 : vector<1x32xf32> to vector<8x32xf32>
    %20 = arith.mulf %17, %19 : vector<8x32xf32>
    %c0_8 = arith.constant 0 : index
    %c0_9 = arith.constant 0 : index
    %21 = vector.load %arg5[%c0_8, %c0_9] : memref<1x32xf32, #tpu.memory_space<vmem>>, vector<1x32xf32>
    %22 = vector.broadcast %21 : vector<1x32xf32> to vector<8x32xf32>
    %23 = arith.addf %20, %22 : vector<8x32xf32>
    %24 = arith.truncf %23 : vector<8x32xf32> to vector<8x32xbf16>
    %25 = arith.truncf %23 : vector<8x32xf32> to vector<8x32xbf16>
    %c0_10 = arith.constant 0 : index
    %c0_11 = arith.constant 0 : index
    %26 = vector.load %arg6[%c0_10, %c0_11] : memref<32x32xf32, #tpu.memory_space<vmem>>, vector<32x32xf32>
    %27 = arith.truncf %26 : vector<32x32xf32> to vector<32x32xbf16>
    %cst_12 = arith.constant dense<0.000000e+00> : vector<8x32xf32>
    %28 = tpu.matmul %24, %27, %cst_12 {dimension_numbers = #tpu.dot_dimension_numbers<[1], [0], [0], [1], [0, 0, 1, 1], [], []>} : vector<8x32xbf16>, vector<32x32xbf16>, vector<8x32xf32> -> vector<8x32xf32>
    %cst_13 = arith.constant 0.353553385 : f32
    %29 = vector.broadcast %cst_13 : f32 to vector<8x32xf32>
    %30 = arith.mulf %28, %29 : vector<8x32xf32>
    %c0_14 = arith.constant 0 : index
    %c0_15 = arith.constant 0 : index
    %31 = vector.load %arg7[%c0_14, %c0_15] : memref<32x32xf32, #tpu.memory_space<vmem>>, vector<32x32xf32>
    %32 = arith.truncf %31 : vector<32x32xf32> to vector<32x32xbf16>
    %cst_16 = arith.constant dense<0.000000e+00> : vector<8x32xf32>
    %33 = tpu.matmul %25, %32, %cst_16 {dimension_numbers = #tpu.dot_dimension_numbers<[1], [0], [0], [1], [0, 0, 1, 1], [], []>} : vector<8x32xbf16>, vector<32x32xbf16>, vector<8x32xf32> -> vector<8x32xf32>
    %c0_17 = arith.constant 0 : index
    %c0_18 = arith.constant 0 : index
    %34 = vector.load %arg8[%c0_17, %c0_18] : memref<32x32xf32, #tpu.memory_space<vmem>>, vector<32x32xf32>
    %35 = arith.truncf %34 : vector<32x32xf32> to vector<32x32xbf16>
    %cst_19 = arith.constant dense<0.000000e+00> : vector<8x32xf32>
    %36 = tpu.matmul %25, %35, %cst_19 {dimension_numbers = #tpu.dot_dimension_numbers<[1], [0], [0], [1], [0, 0, 1, 1], [], []>} : vector<8x32xbf16>, vector<32x32xbf16>, vector<8x32xf32> -> vector<8x32xf32>
    %37 = arith.truncf %30 : vector<8x32xf32> to vector<8x32xbf16>
    %38 = arith.truncf %33 : vector<8x32xf32> to vector<8x32xbf16>
    %39 = arith.truncf %36 : vector<8x32xf32> to vector<8x32xbf16>
    %c0_20 = arith.constant 0 : index
    %40 = memref.load %arg3[%c0_20] : memref<1xf32, #tpu.memory_space<smem>>
    %41 = vector.extract_strided_slice %37 {offsets = [0, 0], sizes = [8, 8], strides = [1, 1]} : vector<8x32xbf16> to vector<8x8xbf16>
    %42 = vector.extract_strided_slice %37 {offsets = [0, 8], sizes = [8, 8], strides = [1, 1]} : vector<8x32xbf16> to vector<8x8xbf16>
    %43 = vector.extract_strided_slice %38 {offsets = [0, 0], sizes = [8, 8], strides = [1, 1]} : vector<8x32xbf16> to vector<8x8xbf16>
    %44 = vector.extract_strided_slice %38 {offsets = [0, 8], sizes = [8, 8], strides = [1, 1]} : vector<8x32xbf16> to vector<8x8xbf16>
    %45 = vector.extract_strided_slice %39 {offsets = [0, 0], sizes = [8, 16], strides = [1, 1]} : vector<8x32xbf16> to vector<8x16xbf16>
    %cst_21 = arith.constant dense<0.000000e+00> : vector<8x8xf32>
    %46 = tpu.matmul %41, %43, %cst_21 {dimension_numbers = #tpu.dot_dimension_numbers<[1], [1], [0], [0], [0, 0, 1, 0], [], []>} : vector<8x8xbf16>, vector<8x8xbf16>, vector<8x8xf32> -> vector<8x8xf32>
    %cst_22 = arith.constant dense<0.000000e+00> : vector<8x8xf32>
    %47 = tpu.matmul %42, %44, %cst_22 {dimension_numbers = #tpu.dot_dimension_numbers<[1], [1], [0], [0], [0, 0, 1, 0], [], []>} : vector<8x8xbf16>, vector<8x8xbf16>, vector<8x8xf32> -> vector<8x8xf32>
    %cst_23 = arith.constant dense<0xFF800000> : vector<8xf32>
    %48 = vector.multi_reduction <maximumf>, %46, %cst_23 [1] : vector<8x8xf32> to vector<8xf32>
    %49 = vector.shape_cast %48 : vector<8xf32> to vector<8x1xf32>
    %50 = vector.broadcast %49 : vector<8x1xf32> to vector<8x8xf32>
    %51 = arith.subf %46, %50 : vector<8x8xf32>
    %52 = math.exp %51 : vector<8x8xf32>
    %cst_24 = arith.constant dense<0.000000e+00> : vector<8xf32>
    %53 = vector.multi_reduction <add>, %52, %cst_24 [1] : vector<8x8xf32> to vector<8xf32>
    %54 = vector.shape_cast %53 : vector<8xf32> to vector<8x1xf32>
    %55 = tpu.reciprocal %54 {approx = true} : vector<8x1xf32> -> vector<8x1xf32>
    %56 = vector.broadcast %55 : vector<8x1xf32> to vector<8x8xf32>
    %57 = arith.mulf %52, %56 : vector<8x8xf32>
    %cst_25 = arith.constant dense<0xFF800000> : vector<8xf32>
    %58 = vector.multi_reduction <maximumf>, %47, %cst_25 [1] : vector<8x8xf32> to vector<8xf32>
    %59 = vector.shape_cast %58 : vector<8xf32> to vector<8x1xf32>
    %60 = vector.broadcast %59 : vector<8x1xf32> to vector<8x8xf32>
    %61 = arith.subf %47, %60 : vector<8x8xf32>
    %62 = math.exp %61 : vector<8x8xf32>
    %cst_26 = arith.constant dense<0.000000e+00> : vector<8xf32>
    %63 = vector.multi_reduction <add>, %62, %cst_26 [1] : vector<8x8xf32> to vector<8xf32>
    %64 = vector.shape_cast %63 : vector<8xf32> to vector<8x1xf32>
    %65 = tpu.reciprocal %64 {approx = true} : vector<8x1xf32> -> vector<8x1xf32>
    %66 = vector.broadcast %65 : vector<8x1xf32> to vector<8x8xf32>
    %67 = arith.mulf %62, %66 : vector<8x8xf32>
    %68 = vector.broadcast %40 : f32 to vector<8x8xf32>
    %69 = arith.mulf %68, %67 : vector<8x8xf32>
    %70 = arith.subf %57, %69 : vector<8x8xf32>
    %71 = arith.truncf %70 : vector<8x8xf32> to vector<8x8xbf16>
    %cst_27 = arith.constant dense<0.000000e+00> : vector<8x16xf32>
    %72 = tpu.matmul %71, %45, %cst_27 {dimension_numbers = #tpu.dot_dimension_numbers<[1], [0], [0], [1], [0, 0, 1, 1], [], []>} : vector<8x8xbf16>, vector<8x16xbf16>, vector<8x16xf32> -> vector<8x16xf32>
    %73 = arith.mulf %72, %72 : vector<8x16xf32>
    %cst_28 = arith.constant dense<0.000000e+00> : vector<8xf32>
    %74 = vector.multi_reduction <add>, %73, %cst_28 [1] : vector<8x16xf32> to vector<8xf32>
    %75 = vector.shape_cast %74 : vector<8xf32> to vector<8x1xf32>
    %cst_29 = arith.constant 1.600000e+01 : f32
    %76 = vector.broadcast %cst_29 : f32 to vector<8x1xf32>
    %77 = arith.divf %75, %76 : vector<8x1xf32>
    %cst_30 = arith.constant 9.99999974E-6 : f32
    %78 = vector.broadcast %cst_30 : f32 to vector<8x1xf32>
    %79 = arith.addf %77, %78 : vector<8x1xf32>
    %80 = math.rsqrt %79 : vector<8x1xf32>
    %81 = vector.broadcast %80 : vector<8x1xf32> to vector<8x16xf32>
    %82 = arith.mulf %72, %81 : vector<8x16xf32>
    %c0_31 = arith.constant 0 : index
    %c0_32 = arith.constant 0 : index
    %83 = vector.load %arg10[%c0_31, %c0_32] : memref<1x16xf32, #tpu.memory_space<vmem>>, vector<1x16xf32>
    %84 = vector.broadcast %83 : vector<1x16xf32> to vector<8x16xf32>
    %85 = arith.mulf %82, %84 : vector<8x16xf32>
    %86 = vector.extract_strided_slice %37 {offsets = [0, 16], sizes = [8, 8], strides = [1, 1]} : vector<8x32xbf16> to vector<8x8xbf16>
    %87 = vector.extract_strided_slice %37 {offsets = [0, 24], sizes = [8, 8], strides = [1, 1]} : vector<8x32xbf16> to vector<8x8xbf16>
    %88 = vector.extract_strided_slice %38 {offsets = [0, 16], sizes = [8, 8], strides = [1, 1]} : vector<8x32xbf16> to vector<8x8xbf16>
    %89 = vector.extract_strided_slice %38 {offsets = [0, 24], sizes = [8, 8], strides = [1, 1]} : vector<8x32xbf16> to vector<8x8xbf16>
    %90 = vector.extract_strided_slice %39 {offsets = [0, 16], sizes = [8, 16], strides = [1, 1]} : vector<8x32xbf16> to vector<8x16xbf16>
    %cst_33 = arith.constant dense<0.000000e+00> : vector<8x8xf32>
    %91 = tpu.matmul %86, %88, %cst_33 {dimension_numbers = #tpu.dot_dimension_numbers<[1], [1], [0], [0], [0, 0, 1, 0], [], []>} : vector<8x8xbf16>, vector<8x8xbf16>, vector<8x8xf32> -> vector<8x8xf32>
    %cst_34 = arith.constant dense<0.000000e+00> : vector<8x8xf32>
    %92 = tpu.matmul %87, %89, %cst_34 {dimension_numbers = #tpu.dot_dimension_numbers<[1], [1], [0], [0], [0, 0, 1, 0], [], []>} : vector<8x8xbf16>, vector<8x8xbf16>, vector<8x8xf32> -> vector<8x8xf32>
    %cst_35 = arith.constant dense<0xFF800000> : vector<8xf32>
    %93 = vector.multi_reduction <maximumf>, %91, %cst_35 [1] : vector<8x8xf32> to vector<8xf32>
    %94 = vector.shape_cast %93 : vector<8xf32> to vector<8x1xf32>
    %95 = vector.broadcast %94 : vector<8x1xf32> to vector<8x8xf32>
    %96 = arith.subf %91, %95 : vector<8x8xf32>
    %97 = math.exp %96 : vector<8x8xf32>
    %cst_36 = arith.constant dense<0.000000e+00> : vector<8xf32>
    %98 = vector.multi_reduction <add>, %97, %cst_36 [1] : vector<8x8xf32> to vector<8xf32>
    %99 = vector.shape_cast %98 : vector<8xf32> to vector<8x1xf32>
    %100 = tpu.reciprocal %99 {approx = true} : vector<8x1xf32> -> vector<8x1xf32>
    %101 = vector.broadcast %100 : vector<8x1xf32> to vector<8x8xf32>
    %102 = arith.mulf %97, %101 : vector<8x8xf32>
    %cst_37 = arith.constant dense<0xFF800000> : vector<8xf32>
    %103 = vector.multi_reduction <maximumf>, %92, %cst_37 [1] : vector<8x8xf32> to vector<8xf32>
    %104 = vector.shape_cast %103 : vector<8xf32> to vector<8x1xf32>
    %105 = vector.broadcast %104 : vector<8x1xf32> to vector<8x8xf32>
    %106 = arith.subf %92, %105 : vector<8x8xf32>
    %107 = math.exp %106 : vector<8x8xf32>
    %cst_38 = arith.constant dense<0.000000e+00> : vector<8xf32>
    %108 = vector.multi_reduction <add>, %107, %cst_38 [1] : vector<8x8xf32> to vector<8xf32>
    %109 = vector.shape_cast %108 : vector<8xf32> to vector<8x1xf32>
    %110 = tpu.reciprocal %109 {approx = true} : vector<8x1xf32> -> vector<8x1xf32>
    %111 = vector.broadcast %110 : vector<8x1xf32> to vector<8x8xf32>
    %112 = arith.mulf %107, %111 : vector<8x8xf32>
    %113 = vector.broadcast %40 : f32 to vector<8x8xf32>
    %114 = arith.mulf %113, %112 : vector<8x8xf32>
    %115 = arith.subf %102, %114 : vector<8x8xf32>
    %116 = arith.truncf %115 : vector<8x8xf32> to vector<8x8xbf16>
    %cst_39 = arith.constant dense<0.000000e+00> : vector<8x16xf32>
    %117 = tpu.matmul %116, %90, %cst_39 {dimension_numbers = #tpu.dot_dimension_numbers<[1], [0], [0], [1], [0, 0, 1, 1], [], []>} : vector<8x8xbf16>, vector<8x16xbf16>, vector<8x16xf32> -> vector<8x16xf32>
    %118 = arith.mulf %117, %117 : vector<8x16xf32>
    %cst_40 = arith.constant dense<0.000000e+00> : vector<8xf32>
    %119 = vector.multi_reduction <add>, %118, %cst_40 [1] : vector<8x16xf32> to vector<8xf32>
    %120 = vector.shape_cast %119 : vector<8xf32> to vector<8x1xf32>
    %cst_41 = arith.constant 1.600000e+01 : f32
    %121 = vector.broadcast %cst_41 : f32 to vector<8x1xf32>
    %122 = arith.divf %120, %121 : vector<8x1xf32>
    %cst_42 = arith.constant 9.99999974E-6 : f32
    %123 = vector.broadcast %cst_42 : f32 to vector<8x1xf32>
    %124 = arith.addf %122, %123 : vector<8x1xf32>
    %125 = math.rsqrt %124 : vector<8x1xf32>
    %126 = vector.broadcast %125 : vector<8x1xf32> to vector<8x16xf32>
    %127 = arith.mulf %117, %126 : vector<8x16xf32>
    %c0_43 = arith.constant 0 : index
    %c0_44 = arith.constant 0 : index
    %128 = vector.load %arg10[%c0_43, %c0_44] : memref<1x16xf32, #tpu.memory_space<vmem>>, vector<1x16xf32>
    %129 = vector.broadcast %128 : vector<1x16xf32> to vector<8x16xf32>
    %130 = arith.mulf %127, %129 : vector<8x16xf32>
    %131 = tpu.concatenate %85, %130 in 1 : vector<8x16xf32>, vector<8x16xf32> -> vector<8x32xf32>
    %cst_45 = arith.constant 0.644490957 : f32
    %132 = vector.broadcast %cst_45 : f32 to vector<8x32xf32>
    %133 = arith.mulf %131, %132 : vector<8x32xf32>
    %134 = arith.truncf %133 : vector<8x32xf32> to vector<8x32xbf16>
    %c0_46 = arith.constant 0 : index
    %c0_47 = arith.constant 0 : index
    %135 = vector.load %arg9[%c0_46, %c0_47] : memref<32x32xf32, #tpu.memory_space<vmem>>, vector<32x32xf32>
    %136 = arith.truncf %135 : vector<32x32xf32> to vector<32x32xbf16>
    %cst_48 = arith.constant dense<0.000000e+00> : vector<8x32xf32>
    %137 = tpu.matmul %134, %136, %cst_48 {dimension_numbers = #tpu.dot_dimension_numbers<[1], [0], [0], [1], [0, 0, 1, 1], [], []>} : vector<8x32xbf16>, vector<32x32xbf16>, vector<8x32xf32> -> vector<8x32xf32>
    %138 = arith.addf %1, %137 : vector<8x32xf32>
    %c0_49 = arith.constant 0 : index
    %c0_50 = arith.constant 0 : index
    %c0_51 = arith.constant 0 : index
    %139 = vector.load %arg11[%c0_49, %c0_50, %c0_51] : memref<1x8x32xf32, #tpu.memory_space<vmem>>, vector<1x8x32xf32>
    %140 = vector.shape_cast %139 : vector<1x8x32xf32> to vector<8x32xf32>
    %141 = vector.shape_cast %138 : vector<8x32xf32> to vector<1x8x32xf32>
    tpu.vector_store %arg11[%c0_49, %c0_50, %c0_51], %141 {strides = array<i32>} : memref<1x8x32xf32, #tpu.memory_space<vmem>>, vector<1x8x32xf32>,
    return
  }
  func.func @transform_0(%arg0: i32) -> (i32, i32, i32) {
    %c0_i32 = arith.constant 0 : i32
    %c0_i32_0 = arith.constant 0 : i32
    %c0_i32_1 = arith.constant 0 : i32
    return %arg0, %c0_i32, %c0_i32_0 : i32, i32, i32
  }
  func.func @transform_1(%arg0: i32) -> (i32, i32, i32) {
    %c0_i32 = arith.constant 0 : i32
    %c0_i32_0 = arith.constant 0 : i32
    %c0_i32_1 = arith.constant 0 : i32
    return %arg0, %c0_i32, %c0_i32_0 : i32, i32, i32
  }
  func.func @transform_2(%arg0: i32) -> i32 {
    %c0_i32 = arith.constant 0 : i32
    %c0_i32_0 = arith.constant 0 : i32
    return %c0_i32 : i32
  }
  func.func @transform_3(%arg0: i32) -> (i32, i32) {
    %c0_i32 = arith.constant 0 : i32
    %c0_i32_0 = arith.constant 0 : i32
    %c0_i32_1 = arith.constant 0 : i32
    return %c0_i32, %c0_i32_0 : i32, i32
  }
  func.func @transform_4(%arg0: i32) -> (i32, i32) {
    %c0_i32 = arith.constant 0 : i32
    %c0_i32_0 = arith.constant 0 : i32
    %c0_i32_1 = arith.constant 0 : i32
    return %c0_i32, %c0_i32_0 : i32, i32
  }
  func.func @transform_5(%arg0: i32) -> (i32, i32) {
    %c0_i32 = arith.constant 0 : i32
    %c0_i32_0 = arith.constant 0 : i32
    %c0_i32_1 = arith.constant 0 : i32
    return %c0_i32, %c0_i32_0 : i32, i32
  }
  func.func @transform_6(%arg0: i32) -> (i32, i32) {
    %c0_i32 = arith.constant 0 : i32
    %c0_i32_0 = arith.constant 0 : i32
    %c0_i32_1 = arith.constant 0 : i32
    return %c0_i32, %c0_i32_0 : i32, i32
  }
  func.func @transform_7(%arg0: i32) -> (i32, i32) {
    %c0_i32 = arith.constant 0 : i32
    %c0_i32_0 = arith.constant 0 : i32
    %c0_i32_1 = arith.constant 0 : i32
    return %c0_i32, %c0_i32_0 : i32, i32
  }
  func.func @transform_8(%arg0: i32) -> (i32, i32) {
    %c0_i32 = arith.constant 0 : i32
    %c0_i32_0 = arith.constant 0 : i32
    %c0_i32_1 = arith.constant 0 : i32
    return %c0_i32, %c0_i32_0 : i32, i32
  }
  func.func @transform_9(%arg0: i32) -> (i32, i32) {
    %c0_i32 = arith.constant 0 : i32
    %c0_i32_0 = arith.constant 0 : i32
    %c0_i32_1 = arith.constant 0 : i32
    return %c0_i32, %c0_i32_0 : i32, i32
  }
  func.func @transform_10(%arg0: i32) -> (i32, i32, i32) {
    %c0_i32 = arith.constant 0 : i32
    %c0_i32_0 = arith.constant 0 : i32
    %c0_i32_1 = arith.constant 0 : i32
    return %arg0, %c0_i32, %c0_i32_0 : i32, i32, i32
  }
}

module attributes {stable_mosaic.version = 11 : i64} {
  func.func @_attn_block_kernel(%arg0: i32, %arg1: memref<1x8x32xf32, #tpu.memory_space<vmem>>, %arg2: memref<1x16x32xf32, #tpu.memory_space<vmem>>, %arg3: memref<1xf32, #tpu.memory_space<smem>>, %arg4: memref<1x32xf32, #tpu.memory_space<vmem>>, %arg5: memref<1x32xf32, #tpu.memory_space<vmem>>, %arg6: memref<32x32xf32, #tpu.memory_space<vmem>>, %arg7: memref<32x32xf32, #tpu.memory_space<vmem>>, %arg8: memref<32x32xf32, #tpu.memory_space<vmem>>, %arg9: memref<32x32xf32, #tpu.memory_space<vmem>>, %arg10: memref<1x16xf32, #tpu.memory_space<vmem>>, %arg11: memref<1x8x32xf32, #tpu.memory_space<vmem>>) attributes {dimension_semantics = [#tpu.dimension_semantics<parallel>], iteration_bounds = array<i64: 2>, scalar_prefetch = 0 : i64, scratch_operands = 0 : i64, tpu.core_type = #tpu.core_type<tc>, window_params = [{transform_indices = @transform_0, window_bounds = array<i64: 1, 8, 32>}, {transform_indices = @transform_1, window_bounds = array<i64: 1, 16, 32>}, {transform_indices = @transform_2, window_bounds = array<i64: 1>}, {pipeline_mode = #tpu.pipeline_mode<synchronous>, transform_indices = @transform_3, window_bounds = array<i64: 1, 32>}, {pipeline_mode = #tpu.pipeline_mode<synchronous>, transform_indices = @transform_4, window_bounds = array<i64: 1, 32>}, {pipeline_mode = #tpu.pipeline_mode<synchronous>, transform_indices = @transform_5, window_bounds = array<i64: 32, 32>}, {pipeline_mode = #tpu.pipeline_mode<synchronous>, transform_indices = @transform_6, window_bounds = array<i64: 32, 32>}, {pipeline_mode = #tpu.pipeline_mode<synchronous>, transform_indices = @transform_7, window_bounds = array<i64: 32, 32>}, {pipeline_mode = #tpu.pipeline_mode<synchronous>, transform_indices = @transform_8, window_bounds = array<i64: 32, 32>}, {pipeline_mode = #tpu.pipeline_mode<synchronous>, transform_indices = @transform_9, window_bounds = array<i64: 1, 16>}, {transform_indices = @transform_10, window_bounds = array<i64: 1, 8, 32>}]} {
    %c0 = arith.constant 0 : index
    %c0_0 = arith.constant 0 : index
    %c0_1 = arith.constant 0 : index
    %0 = vector.load %arg1[%c0, %c0_0, %c0_1] : memref<1x8x32xf32, #tpu.memory_space<vmem>>, vector<1x8x32xf32>
    %1 = vector.shape_cast %0 : vector<1x8x32xf32> to vector<8x32xf32>
    %cst = arith.constant dense<0.000000e+00> : vector<8xf32>
    %2 = vector.multi_reduction <add>, %1, %cst [1] : vector<8x32xf32> to vector<8xf32>
    %3 = vector.shape_cast %2 : vector<8xf32> to vector<8x1xf32>
    %cst_2 = arith.constant 3.200000e+01 : f32
    %4 = vector.broadcast %cst_2 : f32 to vector<8x1xf32>
    %5 = arith.divf %3, %4 : vector<8x1xf32>
    %6 = vector.broadcast %5 : vector<8x1xf32> to vector<8x32xf32>
    %7 = arith.subf %1, %6 : vector<8x32xf32>
    %8 = arith.mulf %7, %7 : vector<8x32xf32>
    %cst_3 = arith.constant dense<0.000000e+00> : vector<8xf32>
    %9 = vector.multi_reduction <add>, %8, %cst_3 [1] : vector<8x32xf32> to vector<8xf32>
    %10 = vector.shape_cast %9 : vector<8xf32> to vector<8x1xf32>
    %cst_4 = arith.constant 3.200000e+01 : f32
    %11 = vector.broadcast %cst_4 : f32 to vector<8x1xf32>
    %12 = arith.divf %10, %11 : vector<8x1xf32>
    %cst_5 = arith.constant 9.99999974E-6 : f32
    %13 = vector.broadcast %cst_5 : f32 to vector<8x1xf32>
    %14 = arith.addf %12, %13 : vector<8x1xf32>
    %15 = math.rsqrt %14 : vector<8x1xf32>
    %16 = vector.broadcast %15 : vector<8x1xf32> to vector<8x32xf32>
    %17 = arith.mulf %7, %16 : vector<8x32xf32>
    %c0_6 = arith.constant 0 : index
    %c0_7 = arith.constant 0 : index
    %18 = vector.load %arg4[%c0_6, %c0_7] : memref<1x32xf32, #tpu.memory_space<vmem>>, vector<1x32xf32>
    %19 = vector.broadcast %18 : vector<1x32xf32> to vector<8x32xf32>
    %20 = arith.mulf %17, %19 : vector<8x32xf32>
    %c0_8 = arith.constant 0 : index
    %c0_9 = arith.constant 0 : index
    %21 = vector.load %arg5[%c0_8, %c0_9] : memref<1x32xf32, #tpu.memory_space<vmem>>, vector<1x32xf32>
    %22 = vector.broadcast %21 : vector<1x32xf32> to vector<8x32xf32>
    %23 = arith.addf %20, %22 : vector<8x32xf32>
    %c0_10 = arith.constant 0 : index
    %c0_11 = arith.constant 0 : index
    %c0_12 = arith.constant 0 : index
    %24 = vector.load %arg2[%c0_10, %c0_11, %c0_12] : memref<1x16x32xf32, #tpu.memory_space<vmem>>, vector<1x16x32xf32>
    %25 = vector.shape_cast %24 : vector<1x16x32xf32> to vector<16x32xf32>
    %26 = arith.truncf %23 : vector<8x32xf32> to vector<8x32xbf16>
    %27 = arith.truncf %25 : vector<16x32xf32> to vector<16x32xbf16>
    %c0_13 = arith.constant 0 : index
    %c0_14 = arith.constant 0 : index
    %28 = vector.load %arg6[%c0_13, %c0_14] : memref<32x32xf32, #tpu.memory_space<vmem>>, vector<32x32xf32>
    %29 = arith.truncf %28 : vector<32x32xf32> to vector<32x32xbf16>
    %cst_15 = arith.constant dense<0.000000e+00> : vector<8x32xf32>
    %30 = tpu.matmul %26, %29, %cst_15 {dimension_numbers = #tpu.dot_dimension_numbers<[1], [0], [0], [1], [0, 0, 1, 1], [], []>} : vector<8x32xbf16>, vector<32x32xbf16>, vector<8x32xf32> -> vector<8x32xf32>
    %cst_16 = arith.constant 0.353553385 : f32
    %31 = vector.broadcast %cst_16 : f32 to vector<8x32xf32>
    %32 = arith.mulf %30, %31 : vector<8x32xf32>
    %c0_17 = arith.constant 0 : index
    %c0_18 = arith.constant 0 : index
    %33 = vector.load %arg7[%c0_17, %c0_18] : memref<32x32xf32, #tpu.memory_space<vmem>>, vector<32x32xf32>
    %34 = arith.truncf %33 : vector<32x32xf32> to vector<32x32xbf16>
    %cst_19 = arith.constant dense<0.000000e+00> : vector<16x32xf32>
    %35 = tpu.matmul %27, %34, %cst_19 {dimension_numbers = #tpu.dot_dimension_numbers<[1], [0], [0], [1], [0, 0, 1, 1], [], []>} : vector<16x32xbf16>, vector<32x32xbf16>, vector<16x32xf32> -> vector<16x32xf32>
    %c0_20 = arith.constant 0 : index
    %c0_21 = arith.constant 0 : index
    %36 = vector.load %arg8[%c0_20, %c0_21] : memref<32x32xf32, #tpu.memory_space<vmem>>, vector<32x32xf32>
    %37 = arith.truncf %36 : vector<32x32xf32> to vector<32x32xbf16>
    %cst_22 = arith.constant dense<0.000000e+00> : vector<16x32xf32>
    %38 = tpu.matmul %27, %37, %cst_22 {dimension_numbers = #tpu.dot_dimension_numbers<[1], [0], [0], [1], [0, 0, 1, 1], [], []>} : vector<16x32xbf16>, vector<32x32xbf16>, vector<16x32xf32> -> vector<16x32xf32>
    %39 = arith.truncf %32 : vector<8x32xf32> to vector<8x32xbf16>
    %40 = arith.truncf %35 : vector<16x32xf32> to vector<16x32xbf16>
    %41 = arith.truncf %38 : vector<16x32xf32> to vector<16x32xbf16>
    %c0_23 = arith.constant 0 : index
    %42 = memref.load %arg3[%c0_23] : memref<1xf32, #tpu.memory_space<smem>>
    %43 = vector.extract_strided_slice %39 {offsets = [0, 0], sizes = [8, 8], strides = [1, 1]} : vector<8x32xbf16> to vector<8x8xbf16>
    %44 = vector.extract_strided_slice %39 {offsets = [0, 8], sizes = [8, 8], strides = [1, 1]} : vector<8x32xbf16> to vector<8x8xbf16>
    %45 = vector.extract_strided_slice %40 {offsets = [0, 0], sizes = [16, 8], strides = [1, 1]} : vector<16x32xbf16> to vector<16x8xbf16>
    %46 = vector.extract_strided_slice %40 {offsets = [0, 8], sizes = [16, 8], strides = [1, 1]} : vector<16x32xbf16> to vector<16x8xbf16>
    %47 = vector.extract_strided_slice %41 {offsets = [0, 0], sizes = [16, 16], strides = [1, 1]} : vector<16x32xbf16> to vector<16x16xbf16>
    %cst_24 = arith.constant dense<0.000000e+00> : vector<8x16xf32>
    %48 = tpu.matmul %43, %45, %cst_24 {dimension_numbers = #tpu.dot_dimension_numbers<[1], [1], [0], [0], [0, 0, 1, 0], [], []>} : vector<8x8xbf16>, vector<16x8xbf16>, vector<8x16xf32> -> vector<8x16xf32>
    %cst_25 = arith.constant dense<0.000000e+00> : vector<8x16xf32>
    %49 = tpu.matmul %44, %46, %cst_25 {dimension_numbers = #tpu.dot_dimension_numbers<[1], [1], [0], [0], [0, 0, 1, 0], [], []>} : vector<8x8xbf16>, vector<16x8xbf16>, vector<8x16xf32> -> vector<8x16xf32>
    %cst_26 = arith.constant dense<0xFF800000> : vector<8xf32>
    %50 = vector.multi_reduction <maximumf>, %48, %cst_26 [1] : vector<8x16xf32> to vector<8xf32>
    %51 = vector.shape_cast %50 : vector<8xf32> to vector<8x1xf32>
    %52 = vector.broadcast %51 : vector<8x1xf32> to vector<8x16xf32>
    %53 = arith.subf %48, %52 : vector<8x16xf32>
    %54 = math.exp %53 : vector<8x16xf32>
    %cst_27 = arith.constant dense<0.000000e+00> : vector<8xf32>
    %55 = vector.multi_reduction <add>, %54, %cst_27 [1] : vector<8x16xf32> to vector<8xf32>
    %56 = vector.shape_cast %55 : vector<8xf32> to vector<8x1xf32>
    %57 = tpu.reciprocal %56 {approx = true} : vector<8x1xf32> -> vector<8x1xf32>
    %58 = vector.broadcast %57 : vector<8x1xf32> to vector<8x16xf32>
    %59 = arith.mulf %54, %58 : vector<8x16xf32>
    %cst_28 = arith.constant dense<0xFF800000> : vector<8xf32>
    %60 = vector.multi_reduction <maximumf>, %49, %cst_28 [1] : vector<8x16xf32> to vector<8xf32>
    %61 = vector.shape_cast %60 : vector<8xf32> to vector<8x1xf32>
    %62 = vector.broadcast %61 : vector<8x1xf32> to vector<8x16xf32>
    %63 = arith.subf %49, %62 : vector<8x16xf32>
    %64 = math.exp %63 : vector<8x16xf32>
    %cst_29 = arith.constant dense<0.000000e+00> : vector<8xf32>
    %65 = vector.multi_reduction <add>, %64, %cst_29 [1] : vector<8x16xf32> to vector<8xf32>
    %66 = vector.shape_cast %65 : vector<8xf32> to vector<8x1xf32>
    %67 = tpu.reciprocal %66 {approx = true} : vector<8x1xf32> -> vector<8x1xf32>
    %68 = vector.broadcast %67 : vector<8x1xf32> to vector<8x16xf32>
    %69 = arith.mulf %64, %68 : vector<8x16xf32>
    %70 = vector.broadcast %42 : f32 to vector<8x16xf32>
    %71 = arith.mulf %70, %69 : vector<8x16xf32>
    %72 = arith.subf %59, %71 : vector<8x16xf32>
    %73 = arith.truncf %72 : vector<8x16xf32> to vector<8x16xbf16>
    %cst_30 = arith.constant dense<0.000000e+00> : vector<8x16xf32>
    %74 = tpu.matmul %73, %47, %cst_30 {dimension_numbers = #tpu.dot_dimension_numbers<[1], [0], [0], [1], [0, 0, 1, 1], [], []>} : vector<8x16xbf16>, vector<16x16xbf16>, vector<8x16xf32> -> vector<8x16xf32>
    %75 = arith.mulf %74, %74 : vector<8x16xf32>
    %cst_31 = arith.constant dense<0.000000e+00> : vector<8xf32>
    %76 = vector.multi_reduction <add>, %75, %cst_31 [1] : vector<8x16xf32> to vector<8xf32>
    %77 = vector.shape_cast %76 : vector<8xf32> to vector<8x1xf32>
    %cst_32 = arith.constant 1.600000e+01 : f32
    %78 = vector.broadcast %cst_32 : f32 to vector<8x1xf32>
    %79 = arith.divf %77, %78 : vector<8x1xf32>
    %cst_33 = arith.constant 9.99999974E-6 : f32
    %80 = vector.broadcast %cst_33 : f32 to vector<8x1xf32>
    %81 = arith.addf %79, %80 : vector<8x1xf32>
    %82 = math.rsqrt %81 : vector<8x1xf32>
    %83 = vector.broadcast %82 : vector<8x1xf32> to vector<8x16xf32>
    %84 = arith.mulf %74, %83 : vector<8x16xf32>
    %c0_34 = arith.constant 0 : index
    %c0_35 = arith.constant 0 : index
    %85 = vector.load %arg10[%c0_34, %c0_35] : memref<1x16xf32, #tpu.memory_space<vmem>>, vector<1x16xf32>
    %86 = vector.broadcast %85 : vector<1x16xf32> to vector<8x16xf32>
    %87 = arith.mulf %84, %86 : vector<8x16xf32>
    %88 = vector.extract_strided_slice %39 {offsets = [0, 16], sizes = [8, 8], strides = [1, 1]} : vector<8x32xbf16> to vector<8x8xbf16>
    %89 = vector.extract_strided_slice %39 {offsets = [0, 24], sizes = [8, 8], strides = [1, 1]} : vector<8x32xbf16> to vector<8x8xbf16>
    %90 = vector.extract_strided_slice %40 {offsets = [0, 16], sizes = [16, 8], strides = [1, 1]} : vector<16x32xbf16> to vector<16x8xbf16>
    %91 = vector.extract_strided_slice %40 {offsets = [0, 24], sizes = [16, 8], strides = [1, 1]} : vector<16x32xbf16> to vector<16x8xbf16>
    %92 = vector.extract_strided_slice %41 {offsets = [0, 16], sizes = [16, 16], strides = [1, 1]} : vector<16x32xbf16> to vector<16x16xbf16>
    %cst_36 = arith.constant dense<0.000000e+00> : vector<8x16xf32>
    %93 = tpu.matmul %88, %90, %cst_36 {dimension_numbers = #tpu.dot_dimension_numbers<[1], [1], [0], [0], [0, 0, 1, 0], [], []>} : vector<8x8xbf16>, vector<16x8xbf16>, vector<8x16xf32> -> vector<8x16xf32>
    %cst_37 = arith.constant dense<0.000000e+00> : vector<8x16xf32>
    %94 = tpu.matmul %89, %91, %cst_37 {dimension_numbers = #tpu.dot_dimension_numbers<[1], [1], [0], [0], [0, 0, 1, 0], [], []>} : vector<8x8xbf16>, vector<16x8xbf16>, vector<8x16xf32> -> vector<8x16xf32>
    %cst_38 = arith.constant dense<0xFF800000> : vector<8xf32>
    %95 = vector.multi_reduction <maximumf>, %93, %cst_38 [1] : vector<8x16xf32> to vector<8xf32>
    %96 = vector.shape_cast %95 : vector<8xf32> to vector<8x1xf32>
    %97 = vector.broadcast %96 : vector<8x1xf32> to vector<8x16xf32>
    %98 = arith.subf %93, %97 : vector<8x16xf32>
    %99 = math.exp %98 : vector<8x16xf32>
    %cst_39 = arith.constant dense<0.000000e+00> : vector<8xf32>
    %100 = vector.multi_reduction <add>, %99, %cst_39 [1] : vector<8x16xf32> to vector<8xf32>
    %101 = vector.shape_cast %100 : vector<8xf32> to vector<8x1xf32>
    %102 = tpu.reciprocal %101 {approx = true} : vector<8x1xf32> -> vector<8x1xf32>
    %103 = vector.broadcast %102 : vector<8x1xf32> to vector<8x16xf32>
    %104 = arith.mulf %99, %103 : vector<8x16xf32>
    %cst_40 = arith.constant dense<0xFF800000> : vector<8xf32>
    %105 = vector.multi_reduction <maximumf>, %94, %cst_40 [1] : vector<8x16xf32> to vector<8xf32>
    %106 = vector.shape_cast %105 : vector<8xf32> to vector<8x1xf32>
    %107 = vector.broadcast %106 : vector<8x1xf32> to vector<8x16xf32>
    %108 = arith.subf %94, %107 : vector<8x16xf32>
    %109 = math.exp %108 : vector<8x16xf32>
    %cst_41 = arith.constant dense<0.000000e+00> : vector<8xf32>
    %110 = vector.multi_reduction <add>, %109, %cst_41 [1] : vector<8x16xf32> to vector<8xf32>
    %111 = vector.shape_cast %110 : vector<8xf32> to vector<8x1xf32>
    %112 = tpu.reciprocal %111 {approx = true} : vector<8x1xf32> -> vector<8x1xf32>
    %113 = vector.broadcast %112 : vector<8x1xf32> to vector<8x16xf32>
    %114 = arith.mulf %109, %113 : vector<8x16xf32>
    %115 = vector.broadcast %42 : f32 to vector<8x16xf32>
    %116 = arith.mulf %115, %114 : vector<8x16xf32>
    %117 = arith.subf %104, %116 : vector<8x16xf32>
    %118 = arith.truncf %117 : vector<8x16xf32> to vector<8x16xbf16>
    %cst_42 = arith.constant dense<0.000000e+00> : vector<8x16xf32>
    %119 = tpu.matmul %118, %92, %cst_42 {dimension_numbers = #tpu.dot_dimension_numbers<[1], [0], [0], [1], [0, 0, 1, 1], [], []>} : vector<8x16xbf16>, vector<16x16xbf16>, vector<8x16xf32> -> vector<8x16xf32>
    %120 = arith.mulf %119, %119 : vector<8x16xf32>
    %cst_43 = arith.constant dense<0.000000e+00> : vector<8xf32>
    %121 = vector.multi_reduction <add>, %120, %cst_43 [1] : vector<8x16xf32> to vector<8xf32>
    %122 = vector.shape_cast %121 : vector<8xf32> to vector<8x1xf32>
    %cst_44 = arith.constant 1.600000e+01 : f32
    %123 = vector.broadcast %cst_44 : f32 to vector<8x1xf32>
    %124 = arith.divf %122, %123 : vector<8x1xf32>
    %cst_45 = arith.constant 9.99999974E-6 : f32
    %125 = vector.broadcast %cst_45 : f32 to vector<8x1xf32>
    %126 = arith.addf %124, %125 : vector<8x1xf32>
    %127 = math.rsqrt %126 : vector<8x1xf32>
    %128 = vector.broadcast %127 : vector<8x1xf32> to vector<8x16xf32>
    %129 = arith.mulf %119, %128 : vector<8x16xf32>
    %c0_46 = arith.constant 0 : index
    %c0_47 = arith.constant 0 : index
    %130 = vector.load %arg10[%c0_46, %c0_47] : memref<1x16xf32, #tpu.memory_space<vmem>>, vector<1x16xf32>
    %131 = vector.broadcast %130 : vector<1x16xf32> to vector<8x16xf32>
    %132 = arith.mulf %129, %131 : vector<8x16xf32>
    %133 = tpu.concatenate %87, %132 in 1 : vector<8x16xf32>, vector<8x16xf32> -> vector<8x32xf32>
    %cst_48 = arith.constant 0.644490957 : f32
    %134 = vector.broadcast %cst_48 : f32 to vector<8x32xf32>
    %135 = arith.mulf %133, %134 : vector<8x32xf32>
    %136 = arith.truncf %135 : vector<8x32xf32> to vector<8x32xbf16>
    %c0_49 = arith.constant 0 : index
    %c0_50 = arith.constant 0 : index
    %137 = vector.load %arg9[%c0_49, %c0_50] : memref<32x32xf32, #tpu.memory_space<vmem>>, vector<32x32xf32>
    %138 = arith.truncf %137 : vector<32x32xf32> to vector<32x32xbf16>
    %cst_51 = arith.constant dense<0.000000e+00> : vector<8x32xf32>
    %139 = tpu.matmul %136, %138, %cst_51 {dimension_numbers = #tpu.dot_dimension_numbers<[1], [0], [0], [1], [0, 0, 1, 1], [], []>} : vector<8x32xbf16>, vector<32x32xbf16>, vector<8x32xf32> -> vector<8x32xf32>
    %140 = arith.addf %1, %139 : vector<8x32xf32>
    %c0_52 = arith.constant 0 : index
    %c0_53 = arith.constant 0 : index
    %c0_54 = arith.constant 0 : index
    %141 = vector.load %arg11[%c0_52, %c0_53, %c0_54] : memref<1x8x32xf32, #tpu.memory_space<vmem>>, vector<1x8x32xf32>
    %142 = vector.shape_cast %141 : vector<1x8x32xf32> to vector<8x32xf32>
    %143 = vector.shape_cast %140 : vector<8x32xf32> to vector<1x8x32xf32>
    tpu.vector_store %arg11[%c0_52, %c0_53, %c0_54], %143 {strides = array<i32>} : memref<1x8x32xf32, #tpu.memory_space<vmem>>, vector<1x8x32xf32>,
    return
  }
  func.func @transform_0(%arg0: i32) -> (i32, i32, i32) {
    %c0_i32 = arith.constant 0 : i32
    %c0_i32_0 = arith.constant 0 : i32
    %c0_i32_1 = arith.constant 0 : i32
    return %arg0, %c0_i32, %c0_i32_0 : i32, i32, i32
  }
  func.func @transform_1(%arg0: i32) -> (i32, i32, i32) {
    %c0_i32 = arith.constant 0 : i32
    %c0_i32_0 = arith.constant 0 : i32
    %c0_i32_1 = arith.constant 0 : i32
    return %arg0, %c0_i32, %c0_i32_0 : i32, i32, i32
  }
  func.func @transform_2(%arg0: i32) -> i32 {
    %c0_i32 = arith.constant 0 : i32
    %c0_i32_0 = arith.constant 0 : i32
    return %c0_i32 : i32
  }
  func.func @transform_3(%arg0: i32) -> (i32, i32) {
    %c0_i32 = arith.constant 0 : i32
    %c0_i32_0 = arith.constant 0 : i32
    %c0_i32_1 = arith.constant 0 : i32
    return %c0_i32, %c0_i32_0 : i32, i32
  }
  func.func @transform_4(%arg0: i32) -> (i32, i32) {
    %c0_i32 = arith.constant 0 : i32
    %c0_i32_0 = arith.constant 0 : i32
    %c0_i32_1 = arith.constant 0 : i32
    return %c0_i32, %c0_i32_0 : i32, i32
  }
  func.func @transform_5(%arg0: i32) -> (i32, i32) {
    %c0_i32 = arith.constant 0 : i32
    %c0_i32_0 = arith.constant 0 : i32
    %c0_i32_1 = arith.constant 0 : i32
    return %c0_i32, %c0_i32_0 : i32, i32
  }
  func.func @transform_6(%arg0: i32) -> (i32, i32) {
    %c0_i32 = arith.constant 0 : i32
    %c0_i32_0 = arith.constant 0 : i32
    %c0_i32_1 = arith.constant 0 : i32
    return %c0_i32, %c0_i32_0 : i32, i32
  }
  func.func @transform_7(%arg0: i32) -> (i32, i32) {
    %c0_i32 = arith.constant 0 : i32
    %c0_i32_0 = arith.constant 0 : i32
    %c0_i32_1 = arith.constant 0 : i32
    return %c0_i32, %c0_i32_0 : i32, i32
  }
  func.func @transform_8(%arg0: i32) -> (i32, i32) {
    %c0_i32 = arith.constant 0 : i32
    %c0_i32_0 = arith.constant 0 : i32
    %c0_i32_1 = arith.constant 0 : i32
    return %c0_i32, %c0_i32_0 : i32, i32
  }
  func.func @transform_9(%arg0: i32) -> (i32, i32) {
    %c0_i32 = arith.constant 0 : i32
    %c0_i32_0 = arith.constant 0 : i32
    %c0_i32_1 = arith.constant 0 : i32
    return %c0_i32, %c0_i32_0 : i32, i32
  }
  func.func @transform_10(%arg0: i32) -> (i32, i32, i32) {
    %c0_i32 = arith.constant 0 : i32
    %c0_i32_0 = arith.constant 0 : i32
    %c0_i32_1 = arith.constant 0 : i32
    return %arg0, %c0_i32, %c0_i32_0 : i32, i32, i32
  }
}

module attributes {stable_mosaic.version = 11 : i64} {
  func.func @_ffn_kernel(%arg0: i32, %arg1: i32, %arg2: memref<8x32xf32, #tpu.memory_space<vmem>>, %arg3: memref<1x32xf32, #tpu.memory_space<vmem>>, %arg4: memref<1x32xf32, #tpu.memory_space<vmem>>, %arg5: memref<32x128xf32, #tpu.memory_space<vmem>>, %arg6: memref<1x128xf32, #tpu.memory_space<vmem>>, %arg7: memref<128x32xf32, #tpu.memory_space<vmem>>, %arg8: memref<1x32xf32, #tpu.memory_space<vmem>>, %arg9: memref<8x32xf32, #tpu.memory_space<vmem>>, %arg10: memref<8x32xf32, #tpu.memory_space<vmem>>) attributes {dimension_semantics = [#tpu.dimension_semantics<parallel>, #tpu.dimension_semantics<arbitrary>], iteration_bounds = array<i64: 2, 1>, scalar_prefetch = 0 : i64, scratch_operands = 1 : i64, tpu.core_type = #tpu.core_type<tc>, window_params = [{transform_indices = @transform_0, window_bounds = array<i64: 8, 32>}, {pipeline_mode = #tpu.pipeline_mode<synchronous>, transform_indices = @transform_1, window_bounds = array<i64: 1, 32>}, {pipeline_mode = #tpu.pipeline_mode<synchronous>, transform_indices = @transform_2, window_bounds = array<i64: 1, 32>}, {transform_indices = @transform_3, window_bounds = array<i64: 32, 128>}, {transform_indices = @transform_4, window_bounds = array<i64: 1, 128>}, {transform_indices = @transform_5, window_bounds = array<i64: 128, 32>}, {pipeline_mode = #tpu.pipeline_mode<synchronous>, transform_indices = @transform_6, window_bounds = array<i64: 1, 32>}, {transform_indices = @transform_7, window_bounds = array<i64: 8, 32>}]} {
    %c0 = arith.constant 0 : index
    %c0_0 = arith.constant 0 : index
    %0 = vector.load %arg2[%c0, %c0_0] : memref<8x32xf32, #tpu.memory_space<vmem>>, vector<8x32xf32>
    %cst = arith.constant dense<0.000000e+00> : vector<8xf32>
    %1 = vector.multi_reduction <add>, %0, %cst [1] : vector<8x32xf32> to vector<8xf32>
    %2 = vector.shape_cast %1 : vector<8xf32> to vector<8x1xf32>
    %cst_1 = arith.constant 3.200000e+01 : f32
    %3 = vector.broadcast %cst_1 : f32 to vector<8x1xf32>
    %4 = arith.divf %2, %3 : vector<8x1xf32>
    %5 = vector.broadcast %4 : vector<8x1xf32> to vector<8x32xf32>
    %6 = arith.subf %0, %5 : vector<8x32xf32>
    %7 = arith.mulf %6, %6 : vector<8x32xf32>
    %cst_2 = arith.constant dense<0.000000e+00> : vector<8xf32>
    %8 = vector.multi_reduction <add>, %7, %cst_2 [1] : vector<8x32xf32> to vector<8xf32>
    %9 = vector.shape_cast %8 : vector<8xf32> to vector<8x1xf32>
    %cst_3 = arith.constant 3.200000e+01 : f32
    %10 = vector.broadcast %cst_3 : f32 to vector<8x1xf32>
    %11 = arith.divf %9, %10 : vector<8x1xf32>
    %cst_4 = arith.constant 9.99999974E-6 : f32
    %12 = vector.broadcast %cst_4 : f32 to vector<8x1xf32>
    %13 = arith.addf %11, %12 : vector<8x1xf32>
    %14 = math.rsqrt %13 : vector<8x1xf32>
    %15 = vector.broadcast %14 : vector<8x1xf32> to vector<8x32xf32>
    %16 = arith.mulf %6, %15 : vector<8x32xf32>
    %c0_5 = arith.constant 0 : index
    %c0_6 = arith.constant 0 : index
    %17 = vector.load %arg3[%c0_5, %c0_6] : memref<1x32xf32, #tpu.memory_space<vmem>>, vector<1x32xf32>
    %18 = vector.broadcast %17 : vector<1x32xf32> to vector<8x32xf32>
    %19 = arith.mulf %16, %18 : vector<8x32xf32>
    %c0_7 = arith.constant 0 : index
    %c0_8 = arith.constant 0 : index
    %20 = vector.load %arg4[%c0_7, %c0_8] : memref<1x32xf32, #tpu.memory_space<vmem>>, vector<1x32xf32>
    %21 = vector.broadcast %20 : vector<1x32xf32> to vector<8x32xf32>
    %22 = arith.addf %19, %21 : vector<8x32xf32>
    %23 = arith.truncf %22 : vector<8x32xf32> to vector<8x32xbf16>
    %c0_9 = arith.constant 0 : index
    %c0_10 = arith.constant 0 : index
    %24 = vector.load %arg5[%c0_9, %c0_10] : memref<32x128xf32, #tpu.memory_space<vmem>>, vector<32x128xf32>
    %25 = arith.truncf %24 : vector<32x128xf32> to vector<32x128xbf16>
    %cst_11 = arith.constant dense<0.000000e+00> : vector<8x128xf32>
    %26 = tpu.matmul %23, %25, %cst_11 {dimension_numbers = #tpu.dot_dimension_numbers<[1], [0], [0], [1], [0, 0, 1, 1], [], []>} : vector<8x32xbf16>, vector<32x128xbf16>, vector<8x128xf32> -> vector<8x128xf32>
    %c0_12 = arith.constant 0 : index
    %c0_13 = arith.constant 0 : index
    %27 = vector.load %arg6[%c0_12, %c0_13] : memref<1x128xf32, #tpu.memory_space<vmem>>, vector<1x128xf32>
    %28 = vector.broadcast %27 : vector<1x128xf32> to vector<8x128xf32>
    %29 = arith.addf %26, %28 : vector<8x128xf32>
    %cst_14 = arith.constant 5.000000e-01 : f32
    %30 = vector.broadcast %cst_14 : f32 to vector<8x128xf32>
    %31 = arith.mulf %30, %29 : vector<8x128xf32>
    %cst_15 = arith.constant 0.707106769 : f32
    %32 = vector.broadcast %cst_15 : f32 to vector<8x128xf32>
    %33 = arith.mulf %29, %32 : vector<8x128xf32>
    %34 = math.erf %33 : vector<8x128xf32>
    %cst_16 = arith.constant 1.000000e+00 : f32
    %35 = vector.broadcast %cst_16 : f32 to vector<8x128xf32>
    %36 = arith.addf %35, %34 : vector<8x128xf32>
    %37 = arith.mulf %31, %36 : vector<8x128xf32>
    %38 = arith.truncf %37 : vector<8x128xf32> to vector<8x128xbf16>
    %c0_17 = arith.constant 0 : index
    %c0_18 = arith.constant 0 : index
    %39 = vector.load %arg7[%c0_17, %c0_18] : memref<128x32xf32, #tpu.memory_space<vmem>>, vector<128x32xf32>
    %40 = arith.truncf %39 : vector<128x32xf32> to vector<128x32xbf16>
    %cst_19 = arith.constant dense<0.000000e+00> : vector<8x32xf32>
    %41 = tpu.matmul %38, %40, %cst_19 {dimension_numbers = #tpu.dot_dimension_numbers<[1], [0], [0], [1], [0, 0, 1, 1], [], []>} : vector<8x128xbf16>, vector<128x32xbf16>, vector<8x32xf32> -> vector<8x32xf32>
    %c0_i32 = arith.constant 0 : i32
    %42 = arith.cmpi eq, %arg1, %c0_i32 : i32
    %43 = arith.extui %42 : i1 to i32
    %c0_i32_20 = arith.constant 0 : i32
    %44 = arith.cmpi ne, %43, %c0_i32_20 : i32
    scf.if %44 {
      %c0_27 = arith.constant 0 : index
      %c0_28 = arith.constant 0 : index
      %51 = vector.load %arg8[%c0_27, %c0_28] : memref<1x32xf32, #tpu.memory_space<vmem>>, vector<1x32xf32>
      %52 = vector.broadcast %51 : vector<1x32xf32> to vector<8x32xf32>
      %53 = arith.addf %0, %52 : vector<8x32xf32>
      %c0_29 = arith.constant 0 : index
      %c0_30 = arith.constant 0 : index
      %54 = vector.load %arg10[%c0_29, %c0_30] : memref<8x32xf32, #tpu.memory_space<vmem>>, vector<8x32xf32>
      tpu.vector_store %arg10[%c0_29, %c0_30], %53 {strides = array<i32>} : memref<8x32xf32, #tpu.memory_space<vmem>>, vector<8x32xf32>,
    } else {
    }
    %c0_21 = arith.constant 0 : index
    %c0_22 = arith.constant 0 : index
    %45 = vector.load %arg10[%c0_21, %c0_22] : memref<8x32xf32, #tpu.memory_space<vmem>>, vector<8x32xf32>
    %46 = arith.addf %45, %41 : vector<8x32xf32>
    %c0_23 = arith.constant 0 : index
    %c0_24 = arith.constant 0 : index
    %47 = vector.load %arg10[%c0_23, %c0_24] : memref<8x32xf32, #tpu.memory_space<vmem>>, vector<8x32xf32>
    tpu.vector_store %arg10[%c0_23, %c0_24], %46 {strides = array<i32>} : memref<8x32xf32, #tpu.memory_space<vmem>>, vector<8x32xf32>,
    %c0_i32_25 = arith.constant 0 : i32
    %48 = arith.cmpi eq, %arg1, %c0_i32_25 : i32
    %49 = arith.extui %48 : i1 to i32
    %c0_i32_26 = arith.constant 0 : i32
    %50 = arith.cmpi ne, %49, %c0_i32_26 : i32
    scf.if %50 {
      %c0_27 = arith.constant 0 : index
      %c0_28 = arith.constant 0 : index
      %51 = vector.load %arg10[%c0_27, %c0_28] : memref<8x32xf32, #tpu.memory_space<vmem>>, vector<8x32xf32>
      %c0_29 = arith.constant 0 : index
      %c0_30 = arith.constant 0 : index
      %52 = vector.load %arg9[%c0_29, %c0_30] : memref<8x32xf32, #tpu.memory_space<vmem>>, vector<8x32xf32>
      tpu.vector_store %arg9[%c0_29, %c0_30], %51 {strides = array<i32>} : memref<8x32xf32, #tpu.memory_space<vmem>>, vector<8x32xf32>,
    } else {
    }
    return
  }
  func.func @transform_0(%arg0: i32, %arg1: i32) -> (i32, i32) {
    %c0_i32 = arith.constant 0 : i32
    %c0_i32_0 = arith.constant 0 : i32
    return %arg0, %c0_i32 : i32, i32
  }
  func.func @transform_1(%arg0: i32, %arg1: i32) -> (i32, i32) {
    %c0_i32 = arith.constant 0 : i32
    %c0_i32_0 = arith.constant 0 : i32
    %c0_i32_1 = arith.constant 0 : i32
    return %c0_i32, %c0_i32_0 : i32, i32
  }
  func.func @transform_2(%arg0: i32, %arg1: i32) -> (i32, i32) {
    %c0_i32 = arith.constant 0 : i32
    %c0_i32_0 = arith.constant 0 : i32
    %c0_i32_1 = arith.constant 0 : i32
    return %c0_i32, %c0_i32_0 : i32, i32
  }
  func.func @transform_3(%arg0: i32, %arg1: i32) -> (i32, i32) {
    %c0_i32 = arith.constant 0 : i32
    %c0_i32_0 = arith.constant 0 : i32
    return %c0_i32, %arg1 : i32, i32
  }
  func.func @transform_4(%arg0: i32, %arg1: i32) -> (i32, i32) {
    %c0_i32 = arith.constant 0 : i32
    %c0_i32_0 = arith.constant 0 : i32
    return %c0_i32, %arg1 : i32, i32
  }
  func.func @transform_5(%arg0: i32, %arg1: i32) -> (i32, i32) {
    %c0_i32 = arith.constant 0 : i32
    %c0_i32_0 = arith.constant 0 : i32
    return %arg1, %c0_i32 : i32, i32
  }
  func.func @transform_6(%arg0: i32, %arg1: i32) -> (i32, i32) {
    %c0_i32 = arith.constant 0 : i32
    %c0_i32_0 = arith.constant 0 : i32
    %c0_i32_1 = arith.constant 0 : i32
    return %c0_i32, %c0_i32_0 : i32, i32
  }
  func.func @transform_7(%arg0: i32, %arg1: i32) -> (i32, i32) {
    %c0_i32 = arith.constant 0 : i32
    %c0_i32_0 = arith.constant 0 : i32
    return %arg0, %c0_i32 : i32, i32
  }
}

</mosaic_0001>

<bundles_post_ra>
// kernel: custom_decoder_layer.4
= control target key start
LH: loop header
LB: loop body
LE: loop exit
PB: predicated region body
PF: predicated region fallthrough
CT: control target
= control target key end

     0   :  { %s1271_s14 = smov 0   ;;  %s1436_s0 = inlined_call_operand.vmem [shape: f32[2,8,32], index: 0, kind: input, shape index: {}, may-alias: {0,1}]   ;;  %s1437_s1 = inlined_call_operand.vmem [shape: f32[2,8,32], index: 1, kind: input, shape index: {}, may-alias: {0,1}]   ;;  %s1438_s2 = inlined_call_operand.<no memory space> [shape: f32[1], index: 2, kind: input, shape index: {}]   ;;  %s1439_s3 = inlined_call_operand.vmem [shape: f32[1,32], index: 3, kind: input, shape index: {}]   ;;  %s1440_s4 = inlined_call_operand.vmem [shape: f32[1,32], index: 4, kind: input, shape index: {}]   ;;  %s1441_s5 = inlined_call_operand.vmem [shape: f32[32,32], index: 5, kind: input, shape index: {}]   ;;  %s1442_s6 = inlined_call_operand.vmem [shape: f32[32,32], index: 6, kind: input, shape index: {}]   ;;  %s1443_s7 = inlined_call_operand.vmem [shape: f32[32,32], index: 7, kind: input, shape index: {}]   ;;  %s1444_s8 = inlined_call_operand.vmem [shape: f32[32,32], index: 8, kind: input, shape index: {}]   ;;  %s1445_s9 = inlined_call_operand.vmem [shape: f32[1,16], index: 9, kind: input, shape index: {}]   ;;  %s1446_s10 = inlined_call_operand.vmem [shape: f32[2,8,32], index: 10, kind: output, shape index: {}]  }
   0x1   :  { %15 = sst [smem:[#allocation2]] %s1438_s2 }
   0x2 LB: > { %s1049_s15 = sadd.s32 4294967295, %s1205_s14   ;;  %p1053_p0 = scmp.ge.s32.totalorder %s1205_s14, 1  ;;  %s1205_s14 = sphi %s1271_s14, %s21_s14  }
   0x3   : > { %p321_p1 = scmp.lt.s32.totalorder %s1205_s14, 3 }
   0x5   : > { %p322_p2 = pnand %p1053_p0, %p321_p1 }
   0x6   : > { %p361_p3 = scmp.lt.s32.totalorder (!%p322_p2), %s1049_s15, 1  ;;  %vm375_vm0 = vcmask (!%p322_p2), 261120   ;;  %v407_v7 = vld [vmem:[%s1441_s5] sm:$0xff] (!%p322_p2)  ;;  %v408_v8 = vld [vmem:[%s1441_s5 + $0x8] sm:$0xff] (!%p322_p2)  ;;  %v1207_v10 = vmov (!%p322_p2), 0.0   ;;  %v409_v13 = vld [vmem:[%s1441_s5 + $0x10] sm:$0xff] (!%p322_p2) }
   0x7   : > { %325 = sbr.rel (%p322_p2) target bundleno = 2453 (0x995), region = 60  ;;  %v457_v9 = vld [vmem:[%s1442_s6] sm:$0xff] (!%p322_p2)  ;;  %1095 = vmatprep.subr.bf16.mxu0 (!%p322_p2), %v1207_v10  ;;  %1103 = vmatprep.subr.bf16.mxu1 (!%p322_p2), %v1207_v10  ;;  %v411_v11 = vpack.c.bf16 (!%p322_p2), %v408_v8, %v407_v7  ;;  %v458_v12 = vld [vmem:[%s1442_s6 + $0x8] sm:$0xff] (!%p322_p2)  ;;  %v410_v14 = vld [vmem:[%s1441_s5 + $0x18] sm:$0xff] (!%p322_p2)  ;;  %vm1208_vm1 = vmmov (!%p322_p2), 0   ;;  %vm553_vm2 = vcmask (!%p322_p2), 64512  }
   0x8   : > { %v461_v15 = vpack.c.bf16 (!%p322_p2), %v458_v12, %v457_v9  ;;  %v459_v16 = vld [vmem:[%s1442_s6 + $0x10] sm:$0xff] (!%p322_p2)  ;;  %v460_v17 = vld [vmem:[%s1442_s6 + $0x18] sm:$0xff] (!%p322_p2)  ;;  %1099 = vmatprep.mubr.msk.bf16.mxu0 (!%p322_p2), %vm1208_vm1, %v1207_v10  ;;  %1107 = vmatprep.mubr.msk.bf16.mxu1 (!%p322_p2), %vm1208_vm1, %v1207_v10  ;;  %v412_v18 = vpack.c.bf16 (!%p322_p2), %v410_v14, %v409_v13  ;;  %v1056_v24 = vld [vmem:[%s1439_s3] ss:$0 sm:$0xff] (!%p322_p2)  ;;  %s1209_s1 = smov (!%p322_p2), 120   ;;  %vm681_vm3 = vcmask (!%p322_p2), 1043456  }
   0x9   : > { %1096 = vmatpush3.bf16.msra.mxu0 (!%p322_p2), %v411_v11  ;;  %v462_v19 = vpack.c.bf16 (!%p322_p2), %v460_v17, %v459_v16  ;;  %v1057_v26 = vld [vmem:[%s1440_s4] ss:$0 sm:$0xff] (!%p322_p2)  ;;  %v504_v29 = vld [vmem:[%s1443_s7 + $0x8] sm:$0xff] (!%p322_p2)  ;;  %v505_v33 = vld [vmem:[%s1443_s7 + $0x10] sm:$0xff] (!%p322_p2)  ;;  %s1210_s28 = smov (!%p322_p2), 104   ;;  %s1211_s29 = smov (!%p322_p2), 112  }
   0xa   : > { %1104 = vmatpush3.bf16.msra.mxu1 (!%p322_p2), %v461_v15  ;;  %1097 = vmatprep.subr.bf16.mxu0 (!%p322_p2), %v1207_v10  ;;  %v503_v28 = vld [vmem:[%s1443_s7] sm:$0xff] (!%p322_p2)  ;;  %v506_v34 = vld [vmem:[%s1443_s7 + $0x18] sm:$0xff] (!%p322_p2)  ;;  %s1377_s30 = sld [smem:[#allocation2]] (!%p322_p2)  ;;  %vm726_vm4 = vcmask (!%p322_p2), 130048   ;;  %s1212_s23 = smov (!%p322_p2), 16  }
   0xb   : > { %1105 = vmatprep.subr.bf16.mxu1 (!%p322_p2), %v1207_v10  ;;  %v507_v31 = vpack.c.bf16 (!%p322_p2), %v504_v29, %v503_v28  ;;  %v508_v35 = vpack.c.bf16 (!%p322_p2), %v506_v34, %v505_v33 }
   0xd   : > { %1098 = vmatpush3.bf16.msra.mxu0 (!%p322_p2), %v412_v18 }
   0xe   : > { %s1448_s15 = smov (!%p361_p3, %s1049_s15), 1  ;;  %1106 = vmatpush3.bf16.msra.mxu1 %v462_v19  ;;  %1111 = vmatprep.subr.bf16.mxu0 %v1207_v10 }
   0xf   : > { %s1054_s2 = sshll.u32 %s1448_s15, 3  ;;  %1119 = vmatprep.subr.bf16.mxu1 %v1207_v10 }
  0x10   : > { %s364_s18 = scalar_lea.vmem %s1436_s0, %s1054_s2  ;;  %s372_s26 = scalar_lea.vmem %s1446_s10, %s1054_s2 }
  0x11   : > { %v1287_v0 = vld [vmem:[%s364_s18] sm:$0xff] }
  0x12   : > { %v376_v1 = vsel %vm375_vm0, %v1287_v0, 0.0 }
  0x13   : > { %377 = vadd.xlane.f32.xlu0 %v376_v1 }
  0xa0   : > { %v378_v2 = vpop.xlane.xlu0 %377 }
  0xa1   : > { %v380_v3 = vmul.f32 0.03125, %v378_v2 }
  0xa3   : > { %v381_v4 = vsub.f32 %v1287_v0, %v380_v3 }
  0xa5   : > { %v382_v5 = vmul.f32 %v381_v4, %v381_v4 }
  0xa7   : > { %v383_v6 = vsel %vm375_vm0, %v382_v5, 0.0 }
  0xa8   : > { %384 = vadd.xlane.f32.xlu0 %v383_v6 }
 0x135   : > { %v385_v20 = vpop.xlane.xlu0 %384 }
 0x136   : > { %v386_v21 = vmul.f32 0.03125, %v385_v20 }
 0x138   : > { %v387_v22 = vadd.f32 1e-05, %v386_v21 }
 0x13a   : > { %1177 = vrsqrt.f32 %v387_v22  ;;  %v674_v22 = vstv %s1377_s30 }
 0x144   : > { %v1178_v23 = vpop.eup %1177 }
 0x145   : > { %v389_v25 = vmul.f32 %v1178_v23, %v381_v4 }
 0x147   : > { %v397_v27 = vmul.f32 %v1056_v24, %v389_v25 }
 0x149   : > { %v405_v30 = vadd.f32 %v1057_v26, %v397_v27 }
 0x14b   : > { %v406_v32 = vpack.c.bf16 %v405_v30, %v405_v30 }
 0x14d   : > { %1100 = vmatmul.mubr.msk.bf16.vlgmr.msra.gmra.mrb[0].mxu0 %vm375_vm0, %v406_v32  ;;  %1108 = vmatmul.mubr.msk.bf16.vlgmr.msra.gmra.mrb[0].mxu1 %vm375_vm0, %v406_v32 }
 0x14e   : > { %1112 = vmatpush3.bf16.msra.mxu0 %v507_v31  ;;  %1115 = vmatprep.mubr.msk.bf16.mxu0 %vm1208_vm1, %v1207_v10 }
 0x14f   : > { %1113 = vmatprep.subr.bf16.mxu0 %v1207_v10  ;;  %1121 = vmatprep.mubr.msk.bf16.mxu1 %vm1208_vm1, %v1207_v10 }
 0x152   : > { %1114 = vmatpush3.bf16.msra.mxu0 %v508_v35 }
 0x153   : > { %1125 = vmatprep.subr.bf16.mxu0 %v1207_v10 }
 0x155   : > { %1116 = vmatmul.mubr.msk.bf16.vlgmr.msra.gmra.mrb[4].mxu0 %vm375_vm0, %v406_v32 }
 0x156   : > { %1127 = vmatprep.mubr.msk.bf16.mxu0 %vm1208_vm1, %v1207_v10 }
 0x220   : > { %v450_v36 = vpop.f32.mrb[0].mxu0  ;;  %v497_v37 = vpop.f32.mrb[0].mxu1 }
 0x221   : > { %v456_v38 = vmul.f32 0.35355338, %v450_v36  ;;  %v550_v39 = vpack.c.bf16 %v497_v37, %v497_v37  ;;  %v1101_v40 = vpop.f32.mrb[1].mxu0  ;;  %v1109_v41 = vpop.f32.mrb[1].mxu1 }
 0x222   : > { %v453_v42 = vpop.f32.mrb[2].mxu0  ;;  %v500_v43 = vpop.f32.mrb[2].mxu1 }
 0x223   : > { %604 = vrot.lane.b32.xlu1 %v550_v39, %s1209_s1  ;;  %v1102_v44 = vpop.f32.mrb[3].mxu0  ;;  %v1110_v45 = vpop.f32.mrb[3].mxu1  ;;  %v558_v46 = vsel %vm553_vm2, %v550_v39, 0  ;;  %v549_v47 = vpack.c.bf16 %v456_v38, %v456_v38 }
 0x224   : > { %1120 = vmatpush3.bf16.xpose.msra.mxu1 %v558_v46 }
 0x225   : > { %1131 = vmatprep.subr.bf16.mxu1 %v1207_v10 }
 0x227   : > { %601 = vrot.lane.b32.xlu1 %v549_v47, %s1209_s1 }
 0x228   : > { %v543_v48 = vpop.f32.mrb[4].mxu0 }
 0x229   : > { %v1358_v49 = vpack.c.bf16 %v543_v48, %v543_v48  ;;  %v1117_v50 = vpop.f32.mrb[5].mxu0 }
 0x22a   : > { %v546_v51 = vpop.f32.mrb[6].mxu0 }
 0x22b   : > { %v683_v52 = vsel %vm681_vm3, %v1358_v49, 0  ;;  %v1118_v53 = vpop.f32.mrb[7].mxu0  ;;  %1122 = vmatmul.mubr.msk.bf16.vlgmr.msra.gmra.mrb[4].mxu1 %vm553_vm2, %v549_v47 }
 0x22c   : > { %1132 = vmatpush3.bf16.msra.mxu1 %v683_v52  ;;  %1133 = vmatprep.mubr.msk.bf16.mxu1 %vm1208_vm1, %v1207_v10 }
 0x22d   : > { %1143 = vmatprep.subr.bf16.mxu1 %v1207_v10 }
 0x295   : > { %v605_v54 = vpop.permute.xlu1 %604 }
 0x296   : > { %v610_v55 = vsel %vm553_vm2, %v605_v54, 0 }
 0x297   : > { %1126 = vmatpush3.bf16.xpose.msra.mxu0 %v610_v55 }
 0x298   : > { %1137 = vmatprep.subr.bf16.mxu0 %v1207_v10 }
 0x299   : > { %v602_v56 = vpop.permute.xlu1 %601 }
 0x29e   : > { %1128 = vmatmul.mubr.msk.bf16.vlgmr.msra.gmra.mrb[8].mxu0 %vm553_vm2, %v602_v56 }
 0x29f   : > { %1139 = vmatprep.mubr.msk.bf16.mxu0 %vm1208_vm1, %v1207_v10 }
 0x2fe   : > { %v594_v57 = vpop.f32.mrb[4].mxu1 }
 0x2ff   : > { %v1123_v58 = vpop.f32.mrb[5].mxu1  ;;  %v652_v59 = vsel %vm553_vm2, %v594_v57, -inf }
 0x300   : > { %653 = vmax.xlane.f32.xlu1 %v652_v59  ;;  %v597_v60 = vpop.f32.mrb[6].mxu1 }
 0x301   : > { %v1124_v61 = vpop.f32.mrb[7].mxu1 }
 0x311   : > { %793 = vrot.lane.b32.xlu1 %v549_v47, %s1210_s28 }
 0x371   : > { %v646_v62 = vpop.f32.mrb[8].mxu0 }
 0x372   : > { %v1129_v63 = vpop.f32.mrb[9].mxu0  ;;  %v663_v1 = vsel %vm553_vm2, %v646_v62, -inf }
 0x373   : > { %664 = vmax.xlane.f32.xlu0 %v663_v1  ;;  %v649_v2 = vpop.f32.mrb[10].mxu0 }
 0x374   : > { %v1130_v3 = vpop.f32.mrb[11].mxu0 }
 0x38d   : > { %v654_v4 = vpop.xlane.xlu1 %653 }
 0x38e   : > { %v655_v5 = vsub.f32 %v594_v57, %v654_v4 }
 0x390   : > { %v656_v6 = vmul.f32 1.442695, %v655_v5 }
 0x391   : > { %v794_v30 = vpop.permute.xlu1 %793 }
 0x392   : > { %1179 = vpow2.f32 %v656_v6 }
 0x39c   : > { %v1180_v7 = vpop.eup %1179 }
 0x39d   : > { %v658_v8 = vsel %vm553_vm2, %v1180_v7, 0.0 }
 0x39e   : > { %659 = vadd.xlane.f32.xlu0 %v658_v8 }
 0x400   : > { %v665_v9 = vpop.xlane.xlu0 %664 }
 0x401   : > { %v666_v11 = vsub.f32 %v646_v62, %v665_v9 }
 0x403   : > { %v667_v12 = vmul.f32 1.442695, %v666_v11 }
 0x405   : > { %1181 = vpow2.f32 %v667_v12  ;;  %v933_v12 = vld [vmem:[%s1444_s8] sm:$0xff] }
 0x40f   : > { %v1182_v13 = vpop.eup %1181 }
 0x410   : > { %v669_v14 = vsel %vm553_vm2, %v1182_v13, 0.0 }
 0x411   : > { %670 = vadd.xlane.f32.xlu0 %v669_v14 }
 0x427   : > { %795 = vrot.lane.b32.xlu0 %v550_v39, %s1210_s28 }
 0x42b   : > { %745 = vrot.lane.b32.xlu0 %v550_v39, %s1211_s29  ;;  %v660_v15 = vpop.xlane.xlu0 %659 }
 0x42c   : > { %1183 = vrcp.f32 %v660_v15 }
 0x42f   : > { %743 = vrot.lane.b32.xlu0 %v549_v47, %s1211_s29 }
 0x436   : > { %v1184_v20 = vpop.eup %1183 }
 0x437   : > { %v662_v24 = vmul.f32 %v1184_v20, %v1180_v7 }
 0x49e   : > { %v671_v16 = vpop.xlane.xlu0 %670 }
 0x49f   : > { %1185 = vrcp.f32 %v671_v16 }
 0x4a2   : > { %v796_v17 = vpop.permute.xlu0 %795 }
 0x4a3   : > { %v801_v29 = vsel %vm553_vm2, %v796_v17, 0 }
 0x4a6   : > { %v746_v18 = vpop.permute.xlu0 %745 }
 0x4a7   : > { %v751_v19 = vsel %vm553_vm2, %v746_v18, 0 }
 0x4a8   : > { %1138 = vmatpush3.bf16.xpose.msra.mxu0 %v751_v19 }
 0x4a9   : > { %v1186_v21 = vpop.eup %1185  ;;  %1149 = vmatprep.subr.bf16.mxu0 %v1207_v10 }
 0x4aa   : > { %v673_v23 = vmul.f32 %v1186_v21, %v1182_v13  ;;  %v744_v26 = vpop.permute.xlu0 %743  ;;  %v934_v13 = vld [vmem:[%s1444_s8 + $0x8] sm:$0xff]  ;;  %v935_v21 = vld [vmem:[%s1444_s8 + $0x10] sm:$0xff] }
 0x4ab   : > { %v937_v14 = vpack.c.bf16 %v934_v13, %v933_v12 }
 0x4ac   : > { %v675_v25 = vmul.f32 %v674_v22, %v673_v23 }
 0x4ae   : > { %v676_v27 = vsub.f32 %v662_v24, %v675_v25  ;;  %v1064_v24 = vld [vmem:[%s1445_s9] ss:$0 sm:$0xff] }
 0x4af   : > { %1140 = vmatmul.mubr.msk.bf16.vlgmr.msra.gmra.mrb[12].mxu0 %vm553_vm2, %v744_v26 }
 0x4b0   : > { %v677_v28 = vpack.c.bf16 %v676_v27, %v676_v27  ;;  %1151 = vmatprep.mubr.msk.bf16.mxu0 %vm1208_vm1, %v1207_v10 }
 0x4b2   : > { %1134 = vmatmul.mubr.msk.bf16.vlgmr.msra.gmra.mrb[8].mxu1 %vm553_vm2, %v677_v28 }
 0x4b3   : > { %1144 = vmatpush3.bf16.xpose.msra.mxu1 %v801_v29  ;;  %1145 = vmatprep.mubr.msk.bf16.mxu1 %vm1208_vm1, %v1207_v10 }
 0x4b4   : > { %1155 = vmatprep.subr.bf16.mxu1 %v1207_v10 }
 0x4ba   : > { %1146 = vmatmul.mubr.msk.bf16.vlgmr.msra.gmra.mrb[12].mxu1 %vm553_vm2, %v794_v30 }
 0x4bb   : > { %1159 = vmatprep.mubr.msk.bf16.mxu1 %vm1208_vm1, %v1207_v10  ;;  %1156 = vmatpush3.bf16.msra.mxu1 %v937_v14 }
 0x4bc   : > { %1157 = vmatprep.subr.bf16.mxu1 %v1207_v10 }
 0x582   : > { %v787_v31 = vpop.f32.mrb[12].mxu0 }
 0x583   : > { %v1141_v32 = vpop.f32.mrb[13].mxu0  ;;  %v843_v33 = vsel %vm553_vm2, %v787_v31, -inf }
 0x584   : > { %844 = vmax.xlane.f32.xlu1 %v843_v33  ;;  %v790_v34 = vpop.f32.mrb[14].mxu0 }
 0x585   : > { %v1394_v35 = vpop.f32.mrb[8].mxu1  ;;  %v1142_v36 = vpop.f32.mrb[15].mxu0 }
 0x586   : > { %v1135_v37 = vpop.f32.mrb[9].mxu1  ;;  %v725_v7 = vmul.f32 %v1394_v35, %v1394_v35 }
 0x587   : > { %v722_v38 = vpop.f32.mrb[10].mxu1 }
 0x588   : > { %v1136_v39 = vpop.f32.mrb[11].mxu1  ;;  %v727_v11 = vsel %vm726_vm4, %v725_v7, 0.0 }
 0x58d   : > { %v837_v40 = vpop.f32.mrb[12].mxu1 }
 0x58e   : > { %v1147_v41 = vpop.f32.mrb[13].mxu1  ;;  %v854_v42 = vsel %vm553_vm2, %v837_v40, -inf }
 0x58f   : > { %855 = vmax.xlane.f32.xlu0 %v854_v42  ;;  %v840_v43 = vpop.f32.mrb[14].mxu1 }
 0x590   : > { %v1148_v44 = vpop.f32.mrb[15].mxu1 }
 0x611   : > { %v845_v45 = vpop.xlane.xlu1 %844 }
 0x612   : > { %v846_v46 = vsub.f32 %v787_v31, %v845_v45 }
 0x614   : > { %v847_v47 = vmul.f32 1.442695, %v846_v46 }
 0x616   : > { %1187 = vpow2.f32 %v847_v47 }
 0x61c   : > { %v856_v48 = vpop.xlane.xlu0 %855 }
 0x61d   : > { %v857_v50 = vsub.f32 %v837_v40, %v856_v48 }
 0x61f   : > { %v858_v51 = vmul.f32 1.442695, %v857_v50 }
 0x620   : > { %v1188_v52 = vpop.eup %1187 }
 0x621   : > { %1189 = vpow2.f32 %v858_v51  ;;  %v849_v53 = vsel %vm553_vm2, %v1188_v52, 0.0 }
 0x622   : > { %850 = vadd.xlane.f32.xlu0 %v849_v53 }
 0x62b   : > { %v1190_v54 = vpop.eup %1189 }
 0x62c   : > { %v860_v55 = vsel %vm553_vm2, %v1190_v54, 0.0 }
 0x62d   : > { %861 = vadd.xlane.f32.xlu0 %v860_v55 }
 0x643   : > { %869 = vrot.lane.b32.xlu0 %v1358_v49, %s1211_s29 }
 0x6af   : > { %v851_v56 = vpop.xlane.xlu0 %850 }
 0x6b0   : > { %1191 = vrcp.f32 %v851_v56 }
 0x6ba   : > { %v862_v57 = vpop.xlane.xlu0 %861  ;;  %v1192_v60 = vpop.eup %1191 }
 0x6bb   : > { %1193 = vrcp.f32 %v862_v57  ;;  %v853_v63 = vmul.f32 %v1192_v60, %v1188_v52 }
 0x6be   : > { %v870_v58 = vpop.permute.xlu0 %869 }
 0x6bf   : > { %v875_v59 = vsel %vm681_vm3, %v870_v58, 0 }
 0x6c0   : > { %1150 = vmatpush3.bf16.msra.mxu0 %v875_v59 }
 0x6c5   : > { %v1194_v61 = vpop.eup %1193 }
 0x6c6   : > { %v864_v62 = vmul.f32 %v1194_v61, %v1190_v54 }
 0x6c8   : > { %v865_v1 = vmul.f32 %v864_v62, %v674_v22  ;;  %v936_v22 = vld [vmem:[%s1444_s8 + $0x18] sm:$0xff] }
 0x6c9   : > { %v938_v23 = vpack.c.bf16 %v936_v22, %v935_v21 }
 0x6ca   : > { %v866_v2 = vsub.f32 %v853_v63, %v865_v1 }
 0x6cb   : > { %1158 = vmatpush3.bf16.msra.mxu1 %v938_v23 }
 0x6cc   : > { %v867_v3 = vpack.c.bf16 %v866_v2, %v866_v2 }
 0x6ce   : > { %1152 = vmatmul.mubr.msk.bf16.vlgmr.msra.gmra.mrb[16].mxu0 %vm553_vm2, %v867_v3 }
 0x7a1   : > { %v911_v4 = vpop.f32.mrb[16].mxu0 }
 0x7a2   : > { %v917_v5 = vmul.f32 %v911_v4, %v911_v4  ;;  %v1153_v49 = vpop.f32.mrb[17].mxu0 }
 0x7a3   : > { %v914_v6 = vpop.f32.mrb[18].mxu0 }
 0x7a4   : > { %v1154_v8 = vpop.f32.mrb[19].mxu0  ;;  %v918_v9 = vsel %vm726_vm4, %v917_v5, 0.0 }
 0x7a5   : > { %919 = vadd.xlane.f32.xlu1 %v918_v9 }
 0x7a9   : > { %728 = vadd.xlane.f32.xlu1 %v727_v11 }
 0x832   : > { %v920_v15 = vpop.xlane.xlu1 %919 }
 0x833   : > { %v921_v16 = vmul.f32 0.0625, %v920_v15 }
 0x835   : > { %v922_v17 = vadd.f32 1e-05, %v921_v16 }
 0x836   : > { %v729_v18 = vpop.xlane.xlu1 %728 }
 0x837   : > { %1195 = vrsqrt.f32 %v922_v17  ;;  %v731_v19 = vmul.f32 0.0625, %v729_v18 }
 0x839   : > { %v732_v20 = vadd.f32 1e-05, %v731_v19 }
 0x83b   : > { %1197 = vrsqrt.f32 %v732_v20 }
 0x841   : > { %v1196_v10 = vpop.eup %1195 }
 0x842   : > { %v924_v25 = vmul.f32 %v1196_v10, %v911_v4 }
 0x844   : > { %v925_v26 = vmul.f32 %v1064_v24, %v924_v25 }
 0x845   : > { %v1198_v27 = vpop.eup %1197 }
 0x846   : > { %927 = vrot.lane.b32.xlu1 %v925_v26, %s1212_s23  ;;  %v734_v28 = vmul.f32 %v1198_v27, %v1394_v35 }
 0x848   : > { %v742_v29 = vmul.f32 %v1064_v24, %v734_v28 }
 0x8b8   : > { %v928_v30 = vpop.permute.xlu1 %927 }
 0x8b9   : > { %v930_v31 = vsel %vm726_vm4, %v742_v29, %v928_v30 }
 0x8ba   : > { %v931_v32 = vmul.f32 0.64449096, %v930_v31 }
 0x8bc   : > { %v932_v33 = vpack.c.bf16 %v931_v32, %v931_v32 }
 0x8be   : > { %1160 = vmatmul.mubr.msk.bf16.vlgmr.msra.gmra.mrb[16].mxu1 %vm375_vm0, %v932_v33 }
 0x991   : > { %v976_v34 = vpop.f32.mrb[16].mxu1 }
 0x992   : > { %v982_v36 = vadd.f32 %v976_v34, %v1287_v0  ;;  %v1161_v37 = vpop.f32.mrb[17].mxu1 }
 0x993   : > { %v979_v38 = vpop.f32.mrb[18].mxu1 }
 0x994   : > { %983 = vst.msk [vmem:[%s372_s26] sm:$0xff] %vm375_vm0, %v982_v36  ;;  %v1162_v35 = vpop.f32.mrb[19].mxu1 }
 0x995 PF: > { %s21_s14 = sadd.s32 1, %s1205_s14  }
 0x996   : > { %p18_p4 = scmp.ge.s32.totalorder %s21_s14, 4  }
 0x998   :  { %20 = sbr.rel (!%p18_p4) target bundleno = 2 (0x2), region = 93 }

// kernel: custom_decoder_layer.5
= control target key start
LH: loop header
LB: loop body
LE: loop exit
PB: predicated region body
PF: predicated region fallthrough
CT: control target
= control target key end

     0   :  { %12 = vsyncpa [#allocation4], 0  ;;  %s1076_s0 = inlined_call_operand.vmem [shape: f32[16,32], index: 0, kind: input, shape index: {}]   ;;  %s1077_s1 = inlined_call_operand.vmem [shape: f32[1,32], index: 1, kind: input, shape index: {}]   ;;  %s1078_s2 = inlined_call_operand.vmem [shape: f32[1,32], index: 2, kind: input, shape index: {}]   ;;  %s1079_s3 = inlined_call_operand.vmem [shape: f32[32,128], index: 3, kind: input, shape index: {}]   ;;  %s1080_s4 = inlined_call_operand.vmem [shape: f32[1,128], index: 4, kind: input, shape index: {}]   ;;  %s1081_s5 = inlined_call_operand.vmem [shape: f32[128,32], index: 5, kind: input, shape index: {}]   ;;  %s1082_s6 = inlined_call_operand.vmem [shape: f32[1,32], index: 6, kind: input, shape index: {}]   ;;  %s1083_s7 = inlined_call_operand.hbm [shape: f32[16,32], index: 7, kind: output, shape index: {}]  }
   0x1   :  { %14 = vsyncpa [#allocation4 + $0x1], 0  ;;  %s886_s24 = smov 0   ;;  %s888_s25 = smov 0  }
   0x2   :  { %s890_s26 = smov 0   ;;  %s892_s27 = smov 0  }
   0x3   :  { %s894_s28 = smov 0   ;;  %s896_s29 = smov 0  }
   0x4 LB: > { %s643_s30 = sadd.s32 4294967295, %s841_s29   ;;  %s644_s8 = sadd.s32 4294967294, %s841_s29   ;;  %s841_s29 = sphi %s896_s29, %s20_s29   ;;  %s837_s28 = sphi %s894_s28, %s1090_s28   ;;  %s833_s27 = sphi %s892_s27, %s1089_s27   ;;  %s829_s26 = sphi %s890_s26, %s1088_s26   ;;  %s825_s25 = sphi %s888_s25, %s1087_s25   ;;  %s821_s24 = sphi %s886_s24, %s1086_s24  }
   0x5   : > { %s32_s9 = sadd.s32 1, %s837_s28  ;;  %s206_s10 = sadd.s32 1, %s829_s26 }
   0x6   : > { %p34_p0 = scmp.ge.s32.totalorder %s32_s9, 2  ;;  %p216_p1 = scmp.ne.s32.totalorder %s829_s26, %s825_s25 }
   0x7   : > { %p217_p2 = scmp.eq.s32.totalorder %s643_s30, 1  ;;  %p222_p3 = scmp.ne.s32.totalorder %s825_s25, %s821_s24 }
   0x8   : > { %s1092_s9 = smov (%p34_p0, %s32_s9), 0  ;;  %p223_p5 = scmp.eq.s32.totalorder %s644_s8, 1 }
   0x9   : > { %p926_p4 = por %p217_p2, %p216_p1  ;;  %s203_s12 = ssub.s32 %s837_s28, %s1092_s9 }
   0xa   : > { %p650_p6 = scmp.ge.s32.totalorder %s841_s29, 1  ;;  %p204_p7 = scmp.eq.s32.totalorder %s203_s12, 0 }
   0xb   : > { %p933_p8 = por %p223_p5, %p222_p3  ;;  %p279_p9 = scmp.lt.s32.totalorder %s841_s29, 3 }
   0xc   : > { %s939_s14 = scalar_select %p204_p7, %s829_s26, %s206_s10  }
   0xd   : > { %p280_p10 = pnand %p650_p6, %p279_p9 }
   0xe   : > { %p322_p11 = scmp.lt.s32.totalorder (!%p280_p10), %s833_s27, 1  ;;  %vm341_vm0 = vcmask (!%p280_p10), 261120   ;;  %v657_v0 = vld [vmem:[%s1082_s6] ss:$0 sm:$0xff] (!%p280_p10)  ;;  %v374_v10 = vld [vmem:[%s1079_s3 + $0x8] sm:$0xff] (!%p280_p10)  ;;  %v843_v12 = vmov (!%p280_p10), 0.0  }
   0xf   : > { %283 = sbr.rel (%p280_p10) target bundleno = 811 (0x32b), region = 48  ;;  %v373_v9 = vld [vmem:[%s1079_s3] sm:$0xff] (!%p280_p10)  ;;  %674 = vmatprep.subr.bf16.mxu0 (!%p280_p10), %v843_v12  ;;  %v375_v13 = vld [vmem:[%s1079_s3 + $0x10] sm:$0xff] (!%p280_p10)  ;;  %v376_v14 = vld [vmem:[%s1079_s3 + $0x18] sm:$0xff] (!%p280_p10)  ;;  %682 = vmatprep.subr.bf16.mxu1 (!%p280_p10), %v843_v12  ;;  %vm844_vm1 = vmmov (!%p280_p10), 0   ;;  %s659_s18 = sshll.u32 (!%p280_p10), %s833_s27, 7 }
  0x10   : > { %v377_v11 = vpack.c.bf16 (!%p280_p10), %v374_v10, %v373_v9  ;;  %v378_v15 = vpack.c.bf16 (!%p280_p10), %v376_v14, %v375_v13  ;;  %678 = vmatprep.mubr.msk.bf16.mxu0 (!%p280_p10), %vm844_vm1, %v843_v12  ;;  %698 = vmatprep.mubr.msk.bf16.mxu1 (!%p280_p10), %vm844_vm1, %v843_v12  ;;  %v435_v16 = vld [vmem:[%s1081_s5] sm:$0xff] (!%p280_p10)  ;;  %v436_v17 = vld [vmem:[%s1081_s5 + $0x8] sm:$0xff] (!%p280_p10)  ;;  %v437_v18 = vld [vmem:[%s1081_s5 + $0x10] sm:$0xff] (!%p280_p10)  ;;  %s1028_s23 = scalar_lea.hbm (!%p280_p10), %s1083_s7, %s659_s18 }
  0x11   : > { %v451_v19 = vpack.c.bf16 (!%p280_p10), %v436_v17, %v435_v16  ;;  %v438_v20 = vld [vmem:[%s1081_s5 + $0x18] sm:$0xff] (!%p280_p10)  ;;  %v439_v22 = vld [vmem:[%s1081_s5 + $0x20] sm:$0xff] (!%p280_p10)  ;;  %v440_v23 = vld [vmem:[%s1081_s5 + $0x28] sm:$0xff] (!%p280_p10) }
  0x12   : > { %675 = vmatpush3.bf16.msra.mxu0 (!%p280_p10), %v377_v11  ;;  %v452_v21 = vpack.c.bf16 (!%p280_p10), %v438_v20, %v437_v18  ;;  %v453_v24 = vpack.c.bf16 (!%p280_p10), %v440_v23, %v439_v22  ;;  %v653_v29 = vld [vmem:[%s1077_s1] ss:$0 sm:$0xff] (!%p280_p10)  ;;  %v441_v35 = vld [vmem:[%s1081_s5 + $0x30] sm:$0xff] (!%p280_p10)  ;;  %v442_v36 = vld [vmem:[%s1081_s5 + $0x38] sm:$0xff] (!%p280_p10) }
  0x13   : > { %676 = vmatprep.subr.bf16.mxu0 (!%p280_p10), %v843_v12  ;;  %683 = vmatpush3.bf16.msra.mxu1 (!%p280_p10), %v451_v19  ;;  %v654_v31 = vld [vmem:[%s1078_s2] ss:$0 sm:$0xff] (!%p280_p10)  ;;  %v454_v37 = vpack.c.bf16 (!%p280_p10), %v442_v36, %v441_v35  ;;  %v444_v39 = vld [vmem:[%s1081_s5 + $0x48] sm:$0xff] (!%p280_p10)  ;;  %v445_v41 = vld [vmem:[%s1081_s5 + $0x50] sm:$0xff] (!%p280_p10) }
  0x14   : > { %684 = vmatprep.subr.bf16.mxu1 (!%p280_p10), %v843_v12  ;;  %v443_v38 = vld [vmem:[%s1081_s5 + $0x40] sm:$0xff] (!%p280_p10)  ;;  %v446_v42 = vld [vmem:[%s1081_s5 + $0x58] sm:$0xff] (!%p280_p10)  ;;  %v448_v45 = vld [vmem:[%s1081_s5 + $0x68] sm:$0xff] (!%p280_p10) }
  0x15   : > { %v455_v40 = vpack.c.bf16 (!%p280_p10), %v444_v39, %v443_v38  ;;  %v456_v43 = vpack.c.bf16 (!%p280_p10), %v446_v42, %v445_v41  ;;  %v447_v44 = vld [vmem:[%s1081_s5 + $0x60] sm:$0xff] (!%p280_p10)  ;;  %v449_v47 = vld [vmem:[%s1081_s5 + $0x70] sm:$0xff] (!%p280_p10)  ;;  %v450_v48 = vld [vmem:[%s1081_s5 + $0x78] sm:$0xff] (!%p280_p10) }
  0x16   : > { %s323_s15 = scalar_select %p322_p11, %s833_s27, 1  ;;  %677 = vmatpush3.bf16.msra.mxu0 %v378_v15  ;;  %v457_v46 = vpack.c.bf16 %v448_v45, %v447_v44  ;;  %v458_v49 = vpack.c.bf16 %v450_v48, %v449_v47  ;;  %v655_v50 = vld [vmem:[%s1080_s4] ss:$0 sm:$0xff] }
  0x17   : > { %685 = vmatpush3.bf16.msra.mxu1 %v452_v21  ;;  %s845_s27 = smov [#allocation3]  }
  0x18   : > { %s652_s16 = sshll.u32 %s323_s15, 3  ;;  %686 = vmatprep.subr.bf16.mxu1 %v843_v12  ;;  %s767_s10 = sshll.u32 %s845_s27, 4  ;;  %s768_s10 = int_to_ptr.vmem [resolvable:$false] %s767_s10 }
  0x19   : > { %s325_s21 = scalar_lea.vmem %s1076_s0, %s652_s16  ;;  %s319_s16 = sand.u32 1, %s825_s25  }
  0x1a   : > { %v340_v1 = vld [vmem:[%s325_s21] sm:$0xff]  ;;  %s651_s17 = sshll.u32 %s319_s16, 3  ;;  %s521_s30 = scalar_lea.sflag [#allocation4], %s319_s16 }
  0x1b   : > { %v342_v2 = vsel %vm341_vm0, %v340_v1, 0.0  ;;  %v510_v3 = vadd.f32 %v657_v0, %v340_v1  ;;  %687 = vmatpush3.bf16.msra.mxu1 %v453_v24  ;;  %s321_s19 = scalar_lea.vmem [#allocation3], %s651_s17  ;;  %s769_s12 = scalar_lea.vmem %s768_s10, 256 }
  0x1c   : > { %343 = vadd.xlane.f32.xlu0 %v342_v2  ;;  %688 = vmatprep.subr.bf16.mxu1 %v843_v12  ;;  %s534_s20 = sshll.u32 %s321_s19, 4  ;;  %s1030_s20 = int_to_ptr.vmem [resolvable:$true] %s534_s20 }
  0x1d   : > { %511 = vst.msk [vmem:[#allocation2] sm:$0xff] %vm341_vm0, %v510_v3  ;;  %s763_s8 = scalar_lea.vmem %s1030_s20, 128  ;;  %p770_p1 = scmp.lt.s32.totalorder %s1030_s20, %s768_s10 }
  0x1e   : > { %p764_p12 = scmp.ne.s32.totalorder %s1030_s20, %s763_s8  ;;  %p771_p2 = scmp.lt.s32.totalorder %s769_s12, %s763_s8 }
  0x1f   : > { %689 = vmatpush3.bf16.msra.mxu1 %v454_v37 }
  0x20   : > { %690 = vmatprep.subr.bf16.mxu1 %v843_v12  ;;  %p765_p13 = pnand %p764_p12, %p926_p4  ;;  %p772_p3 = por %p771_p2, %p770_p1 }
  0x22   : > { %p766_p0 = pneg %p765_p13 }
  0x23   : > { %691 = vmatpush3.bf16.msra.mxu1 %v455_v40 }
  0x24   : > { %692 = vmatprep.subr.bf16.mxu1 %v843_v12  ;;  %v512_v62 = vld [vmem:[#allocation2] sm:$0xff]  ;;  %p773_p5 = pnand %p772_p3, %p766_p0 }
  0x27   : > { %693 = vmatpush3.bf16.msra.mxu1 %v456_v43 }
  0x28   : > { %694 = vmatprep.subr.bf16.mxu1 %v843_v12 }
  0x2b   : > { %695 = vmatpush3.bf16.msra.mxu1 %v457_v46 }
  0x2c   : > { %696 = vmatprep.subr.bf16.mxu1 %v843_v12 }
  0x2f   : > { %697 = vmatpush3.bf16.msra.mxu1 %v458_v49 }
  0xa9   : > { %v344_v4 = vpop.xlane.xlu0 %343 }
  0xaa   : > { %v346_v5 = vmul.f32 0.03125, %v344_v4 }
  0xac   : > { %v347_v6 = vsub.f32 %v340_v1, %v346_v5 }
  0xae   : > { %v348_v7 = vmul.f32 %v347_v6, %v347_v6 }
  0xb0   : > { %v349_v8 = vsel %vm341_vm0, %v348_v7, 0.0 }
  0xb1   : > { %350 = vadd.xlane.f32.xlu0 %v349_v8 }
 0x13e   : > { %v351_v25 = vpop.xlane.xlu0 %350 }
 0x13f   : > { %v352_v26 = vmul.f32 0.03125, %v351_v25 }
 0x141   : > { %v353_v27 = vadd.f32 1e-05, %v352_v26 }
 0x143   : > { %759 = vrsqrt.f32 %v353_v27 }
 0x14d   : > { %v760_v28 = vpop.eup %759 }
 0x14e   : > { %v355_v30 = vmul.f32 %v760_v28, %v347_v6 }
 0x150   : > { %v363_v32 = vmul.f32 %v653_v29, %v355_v30 }
 0x152   : > { %v371_v33 = vadd.f32 %v654_v31, %v363_v32 }
 0x154   : > { %v372_v34 = vpack.c.bf16 %v371_v33, %v371_v33 }
 0x156   : > { %679 = vmatmul.mubr.msk.bf16.vlgmr.msra.gmra.mrb[0].mxu0 %vm341_vm0, %v372_v34 }
 0x229   : > { %v423_v51 = vpop.f32.mrb[0].mxu0 }
 0x22a   : > { %v424_v52 = vadd.f32 %v655_v50, %v423_v51  ;;  %v680_v53 = vpop.f32.mrb[1].mxu0 }
 0x22b   : > { %v426_v54 = vpop.f32.mrb[2].mxu0 }
 0x22c   : > { %v430_v55 = vmul.f32 0.70710677, %v424_v52  ;;  %v681_v56 = vpop.f32.mrb[3].mxu0  ;;  %v429_v58 = vmul.f32 0.5, %v424_v52 }
 0x22e   : > { %761 = verf.f32 %v430_v55 }
 0x238   : > { %v762_v57 = vpop.eup %761 }
 0x239   : > { %v432_v59 = vadd.f32 1.0, %v762_v57 }
 0x23b   : > { %v433_v60 = vmul.f32 %v432_v59, %v429_v58 }
 0x23d   : > { %v434_v61 = vpack.c.bf16 %v433_v60, %v433_v60 }
 0x23f   : > { %699 = vmatmul.mubr.bf16.vlgmr.msra.gmra.mrb[0].mxu1 %v434_v61 }
 0x312   : > { %v493_v63 = vpop.f32.mrb[0].mxu1 }
 0x313   : > { %v513_v0 = vadd.f32 %v512_v62, %v493_v63  ;;  %v700_v1 = vpop.f32.mrb[1].mxu1 }
 0x314   : > { %v496_v2 = vpop.f32.mrb[2].mxu1 }
 0x315   : > { %514 = vst.msk [vmem:[#allocation2] sm:$0xff] %vm341_vm0, %v513_v0  ;;  %v701_v3 = vpop.f32.mrb[3].mxu1 }
 0x31c   : > { %v518_v4 = vld [vmem:[#allocation2] sm:$0xff] }
 0x31d   : > { %519 = vst.msk [vmem:[%s321_s19] sm:$0xff] %vm341_vm0, %v518_v4 }
 0x31e   : > { %776 = shalt.err (!%p773_p5)
}
 0x31f   : > { %s777_s15 = scalar_lea.hbm %s1028_s23, 128  ;;  %s781_s18 = scalar_lea.hbm %s1083_s7, 256 }
 0x320   : > { %p778_p6 = scmp.ne.s32.totalorder %s1028_s23, %s777_s15  ;;  %p782_p10 = scmp.lt.u32.totalorder %s1028_s23, %s1083_s7 }
 0x321   : > { %p783_p11 = scmp.lt.u32.totalorder %s781_s18, %s777_s15  ;;  %p785_p13 = scmp.lt.u32.totalorder %s777_s15, %s1028_s23 }
 0x322   : > { %p779_p7 = pnand %p778_p6, %p926_p4 }
 0x323   : > { %p784_p12 = por %p783_p11, %p782_p10 }
 0x324   : > { %p780_p9 = pneg %p779_p7 }
 0x325   : > { %p786_p0 = por %p785_p13, %p784_p12 }
 0x327   : > { %p787_p1 = pnand %p786_p0, %p780_p9 }
 0x329   : > { %790 = shalt.err (!%p787_p1)
}
 0x32a   : > { %702 = dma.vmem_to_hbm [thread:$0]  (%p926_p4), %s1030_s20, 128, %s1028_s23, %s521_s30  }
 0x32b PF: > { %p708_p2 = scmp.ge.s32.totalorder %s841_s29, 2  ;;  %s546_s22 = sand.u32 1, %s821_s24  }
 0x32c   : > { %s547_s8 = scalar_lea.sflag [#allocation4], %s546_s22 }
 0x32d   : > { %p705_p3 = pnand %p708_p2, %p933_p8 }
 0x32f   : > { %816 = dma.done.wait (!%p705_p3), %s547_s8, 128  }
 0x330   : > { %818 = vsyncadd (!%p705_p3), %s547_s8, 4294967168  ;;  %s20_s29 = sadd.s32 1, %s841_s29   ;;  %s1086_s24 = smov %s825_s25 }
 0x331   : > { %p17_p5 = scmp.ge.s32.totalorder %s20_s29, 4   ;;  %s1087_s25 = smov %s829_s26 }
 0x332   : > { %s1088_s26 = smov %s939_s14  ;;  %s1089_s27 = smov %s837_s28 }
 0x333   : > { %s1090_s28 = smov %s1092_s9  ;;  %19 = sbr.rel (!%p17_p5) target bundleno = 4 (0x4), region = 100 }
 0x33a   :  { %552 = vsyncpa [#allocation4], 1 }
 0x33b   :  { %554 = vsyncpa [#allocation4 + $0x1], 1 }

// kernel: custom_decoder_layer.3
= control target key start
LH: loop header
LB: loop body
LE: loop exit
PB: predicated region body
PF: predicated region fallthrough
CT: control target
= control target key end

     0   :  { %s1736_s0 = inlined_call_operand.vmem [shape: f32[2,8,32], index: 0, kind: input, shape index: {}]   ;;  %s1737_s1 = inlined_call_operand.vmem [shape: f32[2,16,32], index: 1, kind: input, shape index: {}]   ;;  %s1738_s2 = inlined_call_operand.<no memory space> [shape: f32[1], index: 2, kind: input, shape index: {}]   ;;  %s1739_s3 = inlined_call_operand.vmem [shape: f32[1,32], index: 3, kind: input, shape index: {}]   ;;  %s1740_s4 = inlined_call_operand.vmem [shape: f32[1,32], index: 4, kind: input, shape index: {}]   ;;  %s1741_s5 = inlined_call_operand.vmem [shape: f32[32,32], index: 5, kind: input, shape index: {}]   ;;  %s1742_s6 = inlined_call_operand.vmem [shape: f32[32,32], index: 6, kind: input, shape index: {}]   ;;  %s1743_s7 = inlined_call_operand.hbm [shape: f32[32,32], index: 7, kind: input, shape index: {}]   ;;  %s1744_s8 = inlined_call_operand.hbm [shape: f32[32,32], index: 8, kind: input, shape index: {}]   ;;  %s1745_s9 = inlined_call_operand.hbm [shape: f32[1,16], index: 9, kind: input, shape index: {}]   ;;  %s1746_s10 = inlined_call_operand.vmem [shape: f32[2,8,32], index: 10, kind: output, shape index: {}]  }
   0x1   :  { %15 = sst [smem:[#allocation2]] %s1738_s2 }
   0x2   :  { %16 = vsyncpa [#allocation4], 0 }
   0x3   :  { %17 = vsyncpa [#allocation6], 0  ;;  %s1488_s15 = smov 0  }
   0x4 LB: > { %s1494_s16 = sadd.s32 4294967295, %s1417_s15   ;;  %p1129_p0 = scmp.ge.s32.totalorder %s1417_s15, 1  ;;  %s1417_s15 = sphi %s1488_s15, %s23_s15  }
   0x5   : > { %p274_p1 = scmp.lt.s32.totalorder %s1417_s15, 3  ;;  %p1747_p2 = scmp.eq.s32.totalorder %s1494_s16, 0 }
   0x6   : > { %s1419_s17 = smov [#allocation5]   ;;  %s1420_s19 = smov [#allocation3]  }
   0x7   : > { %p1499_p3 = pnand %p1129_p0, %p274_p1  ;;  %s314_s18 = sshll.u32 %s1419_s17, 4  ;;  %s315_s18 = int_to_ptr.vmem [resolvable:$true] %s314_s18 }
   0x8   : > { %s301_s20 = sshll.u32 %s1420_s19, 4  ;;  %s1421_s22 = smov [#allocation7]   ;;  %s1511_s20 = int_to_ptr.vmem [resolvable:$true] %s301_s20 }
   0x9   : > { %s1749_s2 = scalar_select %p1499_p3, 1, 0 }
   0xa   : > { %p1262_p4 = pneg %p1499_p3  ;;  %s328_s23 = sshll.u32 %s1421_s22, 4  ;;  %s1513_s23 = int_to_ptr.vmem [resolvable:$true] %s328_s23 }
   0xb   : > { %s1319_s26 = scalar_lea.hbm %s1744_s8, 512 }
   0xc   : > { %p1507_p5 = pnand %p1747_p2, %p1262_p4  ;;  %p1320_p6 = scmp.ne.s32.totalorder %s1744_s8, %s1319_s26 }
   0xd   : > { %p1326_p10 = scmp.lt.u32.totalorder %s1319_s26, %s1744_s8 }
   0xe   : > { %p1523_p7 = pneg %p1507_p5 }
  0x10   : > { %p1322_p8 = pnand %p1523_p7, %p1320_p6 }
  0x12   : > { %p1323_p9 = pneg %p1322_p8 }
  0x14   : > { %p1328_p11 = pnand %p1326_p10, %p1323_p9 }
  0x16   : > { %1331 = shalt.err (!%p1328_p11)
}
  0x17   : > { %s1332_s12 = scalar_lea.vmem %s315_s18, 512  ;;  %p1340_p1 = scmp.lt.s32.totalorder %s315_s18, %s315_s18 }
  0x18   : > { %p1333_p12 = scmp.ne.s32.totalorder %s315_s18, %s1332_s12  ;;  %p1341_p4 = scmp.lt.s32.totalorder %s1332_s12, %s1332_s12 }
  0x1a   : > { %p1335_p13 = pnand %p1333_p12, %p1523_p7  ;;  %p1342_p2 = por %p1341_p4, %p1340_p1 }
  0x1c   : > { %p1336_p0 = pneg %p1335_p13 }
  0x1e   : > { %p1343_p3 = pnand %p1342_p2, %p1336_p0 }
  0x20   : > { %1346 = shalt.err (!%p1343_p3)
}
  0x21   : > { %s1422_s13 = smov 128   ;;  %s1423_s14 = smov 8  }
  0x22   : > { %1268 = dma.hbm_to_vmem [thread:$0]  (!%p1507_p5), %s1744_s8, 512, %s315_s18, [#allocation6], %s1422_s13, %s1422_s13, %s1423_s14  }
  0x23   : > { %s1347_s25 = scalar_lea.hbm %s1743_s7, 512 }
  0x24   : > { %p1348_p6 = scmp.ne.s32.totalorder %s1743_s7, %s1347_s25  ;;  %p1354_p8 = scmp.lt.u32.totalorder %s1347_s25, %s1743_s7 }
  0x26   : > { %p1350_p2 = pnand %p1348_p6, %p1523_p7 }
  0x28   : > { %p1351_p3 = pneg %p1350_p2 }
  0x2a   : > { %p1356_p9 = pnand %p1354_p8, %p1351_p3 }
  0x2c   : > { %1359 = shalt.err (!%p1356_p9)
}
  0x2d   : > { %s1360_s18 = scalar_lea.vmem %s1511_s20, 512  ;;  %p1368_p13 = scmp.lt.s32.totalorder %s1511_s20, %s1511_s20 }
  0x2e   : > { %p1361_p10 = scmp.ne.s32.totalorder %s1511_s20, %s1360_s18  ;;  %p1369_p0 = scmp.lt.s32.totalorder %s1360_s18, %s1360_s18 }
  0x30   : > { %p1363_p11 = pnand %p1361_p10, %p1523_p7  ;;  %p1370_p1 = por %p1369_p0, %p1368_p13 }
  0x32   : > { %p1364_p12 = pneg %p1363_p11 }
  0x34   : > { %p1371_p4 = pnand %p1370_p1, %p1364_p12 }
  0x36   : > { %1374 = shalt.err (!%p1371_p4)
}
  0x37   : > { %1265 = dma.hbm_to_vmem [thread:$0]  (!%p1507_p5), %s1743_s7, 512, %s1511_s20, [#allocation4], %s1422_s13, %s1422_s13, %s1423_s14  }
  0x38   : > { %s1375_s22 = scalar_lea.hbm %s1745_s9, 16 }
  0x39   : > { %p1376_p6 = scmp.ne.s32.totalorder %s1745_s9, %s1375_s22  ;;  %p1382_p8 = scmp.lt.u32.totalorder %s1375_s22, %s1745_s9 }
  0x3b   : > { %p1378_p2 = pnand %p1376_p6, %p1523_p7 }
  0x3d   : > { %p1379_p3 = pneg %p1378_p2 }
  0x3f   : > { %p1384_p9 = pnand %p1382_p8, %p1379_p3 }
  0x41   : > { %1387 = shalt.err (!%p1384_p9)
}
  0x42   : > { %s1388_s20 = scalar_lea.vmem %s1513_s23, 16  ;;  %s1395_s13 = scalar_lea.vmem %s1513_s23, 32 }
  0x43   : > { %p1389_p10 = scmp.ne.s32.totalorder %s1513_s23, %s1388_s20  ;;  %p1396_p13 = scmp.lt.s32.totalorder %s1513_s23, %s1513_s23 }
  0x44   : > { %p1397_p0 = scmp.lt.s32.totalorder %s1395_s13, %s1388_s20 }
  0x45   : > { %p1391_p11 = pnand %p1389_p10, %p1523_p7 }
  0x46   : > { %p1398_p1 = por %p1397_p0, %p1396_p13 }
  0x47   : > { %p1392_p12 = pneg %p1391_p11 }
  0x49   : > { %p1399_p4 = pnand %p1398_p1, %p1392_p12 }
  0x4b   : > { %1402 = shalt.err (!%p1399_p4)
}
  0x4c   : > { %1271 = dma.hbm_to_vmem [thread:$0]  (!%p1507_p5), %s1745_s9, 16, %s1513_s23, [#allocation6]  }
  0x4d   : > { %p1752_p6 = scmp.ne.s32.totalorder %s1749_s2, 0 }
  0x4e   : > { %p1753_p7 = scmp.eq.s32.totalorder (!%p1752_p6), %s1494_s16, 0 }
  0x4f   : > { %356 = sbr.rel (%p1752_p6) target bundleno = 2526 (0x9de), region = 60 }
  0x56   : > { %1408 = dma.done.wait (%p1753_p7), [#allocation4], 512   ;;  %p1754_p2 = pmov %p1753_p7 }
  0x58   : > { %1410 = vsyncadd (%p1754_p2), [#allocation4], 4294966784  ;;  %p1755_p3 = pmov %p1754_p2 }
  0x59   : > { %p1756_p8 = pmov %p1754_p2 }
  0x5a   : > { %1412 = dma.done.wait (%p1755_p3), [#allocation6], 528  }
  0x5b   : > { %1414 = vsyncadd (%p1756_p8), [#allocation6], 4294966768  ;;  %p405_p9 = scmp.lt.s32.totalorder %s1494_s16, 1  ;;  %vm420_vm0 = vcmask 261120   ;;  %v505_v7 = vld [vmem:[%s1742_s6] sm:$0xff]  ;;  %v506_v8 = vld [vmem:[%s1742_s6 + $0x8] sm:$0xff] }
  0x5c   : > { %v509_v9 = vpack.c.bf16 %v506_v8, %v505_v7  ;;  %v1424_v10 = vmov 0.0   ;;  %v507_v11 = vld [vmem:[%s1742_s6 + $0x10] sm:$0xff]  ;;  %v508_v12 = vld [vmem:[%s1742_s6 + $0x18] sm:$0xff]  ;;  %vm1425_vm1 = vmmov 0   ;;  %v455_v16 = vld [vmem:[%s1741_s5] sm:$0xff]  ;;  %vm606_vm2 = vcmask 64512  }
  0x5d   : > { %s1758_s16 = smov (!%p405_p9, %s1494_s16), 1  ;;  %1190 = vmatprep.subr.bf16.mxu1 %v1424_v10  ;;  %1182 = vmatprep.subr.bf16.mxu0 %v1424_v10  ;;  %v510_v14 = vpack.c.bf16 %v508_v12, %v507_v11  ;;  %v456_v17 = vld [vmem:[%s1741_s5 + $0x8] sm:$0xff]  ;;  %v457_v19 = vld [vmem:[%s1741_s5 + $0x10] sm:$0xff]  ;;  %v458_v20 = vld [vmem:[%s1741_s5 + $0x18] sm:$0xff]  ;;  %s1426_s22 = smov 120   ;;  %vm705_vm3 = vcmask 130048  }
  0x5e   : > { %s1138_s2 = sshll.u32 %s1758_s16, 3  ;;  %s1157_s30 = sshll.u32 %s1758_s16, 4  ;;  %1191 = vmatpush3.bf16.msra.mxu1 %v509_v9  ;;  %1194 = vmatprep.mubr.msk.bf16.mxu1 %vm1425_vm1, %v1424_v10  ;;  %v459_v18 = vpack.c.bf16 %v456_v17, %v455_v16  ;;  %v460_v22 = vpack.c.bf16 %v458_v20, %v457_v19  ;;  %v1142_v27 = vld [vmem:[%s1739_s3] ss:$0 sm:$0xff]  ;;  %v556_v40 = vld [vmem:[#allocation3 + $0x8] sm:$0xff]  ;;  %v557_v41 = vld [vmem:[#allocation3 + $0x10] sm:$0xff] }
  0x5f   : > { %s408_s29 = scalar_lea.vmem %s1736_s0, %s1138_s2  ;;  %s413_s12 = scalar_lea.vmem %s1737_s1, %s1157_s30  ;;  %1192 = vmatprep.subr.bf16.mxu1 %v1424_v10  ;;  %1186 = vmatprep.mubr.msk.bf16.mxu0 %vm1425_vm1, %v1424_v10  ;;  %v1143_v29 = vld [vmem:[%s1740_s4] ss:$0 sm:$0xff]  ;;  %v558_v43 = vld [vmem:[#allocation3 + $0x18] sm:$0xff] }
  0x60   : > { %v1606_v0 = vld [vmem:[%s408_s29] sm:$0xff]  ;;  %v452_v15 = vld [vmem:[%s413_s12 + $0x8] sm:$0xff]  ;;  %1183 = vmatpush3.bf16.msra.mxu0 %v459_v18  ;;  %v560_v44 = vpack.c.bf16 %v558_v43, %v557_v41  ;;  %s1427_s24 = smov 104   ;;  %s1428_s25 = smov 112  }
  0x61   : > { %v421_v1 = vsel %vm420_vm0, %v1606_v0, 0.0  ;;  %v451_v13 = vld [vmem:[%s413_s12] sm:$0xff]  ;;  %1184 = vmatprep.subr.bf16.mxu0 %v1424_v10  ;;  %s1693_s26 = sld [smem:[#allocation2]]  ;;  %s1429_s27 = smov 16  }
  0x62   : > { %422 = vadd.xlane.f32.xlu0 %v421_v1  ;;  %v454_v21 = vpack.c.bf16 %v452_v15, %v451_v13  ;;  %1193 = vmatpush3.bf16.msra.mxu1 %v510_v14  ;;  %v555_v39 = vld [vmem:[#allocation3] sm:$0xff]  ;;  %s417_s14 = scalar_lea.vmem %s1746_s10, %s1138_s2 }
  0x63   : > { %1206 = vmatprep.subr.bf16.mxu1 %v1424_v10  ;;  %v559_v42 = vpack.c.bf16 %v556_v40, %v555_v39 }
  0x64   : > { %1185 = vmatpush3.bf16.msra.mxu0 %v460_v22 }
  0x65   : > { %1195 = vmatmul.mubr.msk.bf16.vlgmr.msra.gmra.mrb[0].mxu1 %vm420_vm0, %v454_v21  ;;  %1198 = vmatprep.subr.bf16.mxu0 %v1424_v10 }
  0x66   : > { %1208 = vmatprep.mubr.msk.bf16.mxu1 %vm1425_vm1, %v1424_v10 }
  0xef   : > { %v423_v2 = vpop.xlane.xlu0 %422 }
  0xf0   : > { %v425_v3 = vmul.f32 0.03125, %v423_v2 }
  0xf2   : > { %v426_v4 = vsub.f32 %v1606_v0, %v425_v3 }
  0xf4   : > { %v427_v5 = vmul.f32 %v426_v4, %v426_v4 }
  0xf6   : > { %v428_v6 = vsel %vm420_vm0, %v427_v5, 0.0 }
  0xf7   : > { %429 = vadd.xlane.f32.xlu0 %v428_v6 }
 0x138   : > { %v548_v33 = vpop.f32.mrb[0].mxu1 }
 0x139   : > { %v1196_v34 = vpop.f32.mrb[1].mxu1 }
 0x13a   : > { %v551_v35 = vpop.f32.mrb[2].mxu1 }
 0x13b   : > { %v1662_v36 = vpack.c.bf16 %v551_v35, %v548_v33  ;;  %v1197_v37 = vpop.f32.mrb[3].mxu1 }
 0x13d   : > { %657 = vrot.lane.b32.xlu1 %v1662_v36, %s1426_s22  ;;  %v611_v38 = vsel %vm606_vm2, %v1662_v36, 0 }
 0x13e   : > { %1207 = vmatpush3.bf16.xpose.msra.mxu1 %v611_v38 }
 0x13f   : > { %1218 = vmatprep.subr.bf16.mxu1 %v1424_v10 }
 0x184   : > { %v430_v23 = vpop.xlane.xlu0 %429 }
 0x185   : > { %v431_v24 = vmul.f32 0.03125, %v430_v23 }
 0x187   : > { %v432_v25 = vadd.f32 1e-05, %v431_v24  ;;  %v728_v24 = vstv %s1693_s26 }
 0x189   : > { %1297 = vrsqrt.f32 %v432_v25 }
 0x193   : > { %v1298_v26 = vpop.eup %1297 }
 0x194   : > { %v434_v28 = vmul.f32 %v1298_v26, %v426_v4 }
 0x196   : > { %v442_v30 = vmul.f32 %v1142_v27, %v434_v28 }
 0x198   : > { %v450_v31 = vadd.f32 %v1143_v29, %v442_v30 }
 0x19a   : > { %v453_v32 = vpack.c.bf16 %v450_v31, %v450_v31 }
 0x19c   : > { %1187 = vmatmul.mubr.msk.bf16.vlgmr.msra.gmra.mrb[0].mxu0 %vm420_vm0, %v453_v32 }
 0x19d   : > { %1202 = vmatprep.mubr.msk.bf16.mxu0 %vm1425_vm1, %v1424_v10  ;;  %1199 = vmatpush3.bf16.msra.mxu0 %v559_v42 }
 0x19e   : > { %1200 = vmatprep.subr.bf16.mxu0 %v1424_v10 }
 0x1a1   : > { %1201 = vmatpush3.bf16.msra.mxu0 %v560_v44 }
 0x1a2   : > { %1212 = vmatprep.subr.bf16.mxu0 %v1424_v10 }
 0x1a4   : > { %1203 = vmatmul.mubr.msk.bf16.vlgmr.msra.gmra.mrb[4].mxu0 %vm420_vm0, %v454_v21 }
 0x1a5   : > { %1214 = vmatprep.mubr.msk.bf16.mxu0 %vm1425_vm1, %v1424_v10 }
 0x1af   : > { %v658_v45 = vpop.permute.xlu1 %657 }
 0x1b0   : > { %v663_v46 = vsel %vm606_vm2, %v658_v45, 0 }
 0x1b1   : > { %1213 = vmatpush3.bf16.xpose.msra.mxu0 %v663_v46 }
 0x1b2   : > { %1224 = vmatprep.subr.bf16.mxu0 %v1424_v10 }
 0x26f   : > { %v498_v47 = vpop.f32.mrb[0].mxu0 }
 0x270   : > { %v504_v48 = vmul.f32 0.35355338, %v498_v47  ;;  %v1188_v49 = vpop.f32.mrb[1].mxu0 }
 0x271   : > { %v501_v50 = vpop.f32.mrb[2].mxu0 }
 0x272   : > { %v602_v51 = vpack.c.bf16 %v504_v48, %v504_v48  ;;  %v1189_v52 = vpop.f32.mrb[3].mxu0 }
 0x274   : > { %654 = vrot.lane.b32.xlu1 %v602_v51, %s1426_s22  ;;  %1209 = vmatmul.mubr.msk.bf16.vlgmr.msra.gmra.mrb[4].mxu1 %vm606_vm2, %v602_v51 }
 0x275   : > { %1220 = vmatprep.mubr.msk.bf16.mxu1 %vm1425_vm1, %v1424_v10 }
 0x277   : > { %v595_v53 = vpop.f32.mrb[4].mxu0 }
 0x278   : > { %v1204_v54 = vpop.f32.mrb[5].mxu0 }
 0x279   : > { %v598_v55 = vpop.f32.mrb[6].mxu0 }
 0x27a   : > { %v1678_v56 = vpack.c.bf16 %v598_v55, %v595_v53  ;;  %v1205_v57 = vpop.f32.mrb[7].mxu0 }
 0x27c   : > { %1219 = vmatpush3.bf16.msra.mxu1 %v1678_v56 }
 0x27d   : > { %1230 = vmatprep.subr.bf16.mxu1 %v1424_v10 }
 0x2e6   : > { %v655_v58 = vpop.permute.xlu1 %654 }
 0x2e7   : > { %1215 = vmatmul.mubr.msk.bf16.vlgmr.msra.gmra.mrb[8].mxu0 %vm606_vm2, %v655_v58 }
 0x2e8   : > { %1226 = vmatprep.mubr.msk.bf16.mxu0 %vm1425_vm1, %v1424_v10 }
 0x347   : > { %v647_v59 = vpop.f32.mrb[4].mxu1 }
 0x348   : > { %v1210_v60 = vpop.f32.mrb[5].mxu1  ;;  %v706_v61 = vsel %vm705_vm3, %v647_v59, -inf }
 0x349   : > { %707 = vmax.xlane.f32.xlu1 %v706_v61  ;;  %v650_v62 = vpop.f32.mrb[6].mxu1 }
 0x34a   : > { %v1211_v63 = vpop.f32.mrb[7].mxu1 }
 0x35a   : > { %842 = vrot.lane.b32.xlu1 %v602_v51, %s1427_s24 }
 0x3ba   : > { %v699_v1 = vpop.f32.mrb[8].mxu0 }
 0x3bb   : > { %v1216_v2 = vpop.f32.mrb[9].mxu0  ;;  %v717_v3 = vsel %vm705_vm3, %v699_v1, -inf }
 0x3bc   : > { %718 = vmax.xlane.f32.xlu0 %v717_v3  ;;  %v702_v4 = vpop.f32.mrb[10].mxu0 }
 0x3bd   : > { %v1217_v5 = vpop.f32.mrb[11].mxu0 }
 0x3d6   : > { %v708_v6 = vpop.xlane.xlu1 %707 }
 0x3d7   : > { %v709_v7 = vsub.f32 %v647_v59, %v708_v6 }
 0x3d9   : > { %v710_v8 = vmul.f32 1.442695, %v709_v7 }
 0x3da   : > { %v843_v32 = vpop.permute.xlu1 %842 }
 0x3db   : > { %1299 = vpow2.f32 %v710_v8 }
 0x3e5   : > { %v1300_v9 = vpop.eup %1299 }
 0x3e6   : > { %v712_v11 = vsel %vm705_vm3, %v1300_v9, 0.0 }
 0x3e7   : > { %713 = vadd.xlane.f32.xlu0 %v712_v11 }
 0x449   : > { %v719_v12 = vpop.xlane.xlu0 %718 }
 0x44a   : > { %v720_v13 = vsub.f32 %v699_v1, %v719_v12 }
 0x44c   : > { %v721_v14 = vmul.f32 1.442695, %v720_v13  ;;  %v980_v13 = vld [vmem:[#allocation5] sm:$0xff] }
 0x44e   : > { %1301 = vpow2.f32 %v721_v14  ;;  %v981_v14 = vld [vmem:[#allocation5 + $0x8] sm:$0xff] }
 0x458   : > { %v1302_v15 = vpop.eup %1301 }
 0x459   : > { %v723_v16 = vsel %vm705_vm3, %v1302_v15, 0.0 }
 0x45a   : > { %724 = vadd.xlane.f32.xlu0 %v723_v16 }
 0x470   : > { %844 = vrot.lane.b32.xlu0 %v1662_v36, %s1427_s24 }
 0x474   : > { %794 = vrot.lane.b32.xlu0 %v1662_v36, %s1428_s25  ;;  %v714_v17 = vpop.xlane.xlu0 %713 }
 0x475   : > { %1303 = vrcp.f32 %v714_v17 }
 0x478   : > { %792 = vrot.lane.b32.xlu0 %v602_v51, %s1428_s25 }
 0x47f   : > { %v1304_v22 = vpop.eup %1303 }
 0x480   : > { %v716_v26 = vmul.f32 %v1304_v22, %v1300_v9  ;;  %v982_v22 = vld [vmem:[#allocation5 + $0x10] sm:$0xff] }
 0x4e7   : > { %v725_v18 = vpop.xlane.xlu0 %724 }
 0x4e8   : > { %1305 = vrcp.f32 %v725_v18 }
 0x4eb   : > { %v845_v19 = vpop.permute.xlu0 %844 }
 0x4ec   : > { %v850_v31 = vsel %vm606_vm2, %v845_v19, 0 }
 0x4ef   : > { %v795_v20 = vpop.permute.xlu0 %794 }
 0x4f0   : > { %v800_v21 = vsel %vm606_vm2, %v795_v20, 0 }
 0x4f1   : > { %1225 = vmatpush3.bf16.xpose.msra.mxu0 %v800_v21 }
 0x4f2   : > { %v1306_v23 = vpop.eup %1305  ;;  %1236 = vmatprep.subr.bf16.mxu0 %v1424_v10 }
 0x4f3   : > { %v727_v25 = vmul.f32 %v1306_v23, %v1302_v15  ;;  %v793_v28 = vpop.permute.xlu0 %792  ;;  %v984_v15 = vpack.c.bf16 %v981_v14, %v980_v13  ;;  %v983_v23 = vld [vmem:[#allocation5 + $0x18] sm:$0xff] }
 0x4f5   : > { %v729_v27 = vmul.f32 %v728_v24, %v727_v25 }
 0x4f7   : > { %v730_v29 = vsub.f32 %v716_v26, %v729_v27  ;;  %v1150_v26 = vld [vmem:[#allocation7] ss:$0 sm:$0xff] }
 0x4f8   : > { %1227 = vmatmul.mubr.msk.bf16.vlgmr.msra.gmra.mrb[12].mxu0 %vm606_vm2, %v793_v28 }
 0x4f9   : > { %v731_v30 = vpack.c.bf16 %v730_v29, %v730_v29  ;;  %1238 = vmatprep.mubr.msk.bf16.mxu0 %vm1425_vm1, %v1424_v10 }
 0x4fb   : > { %1221 = vmatmul.mubr.msk.bf16.vlgmr.msra.gmra.mrb[8].mxu1 %vm705_vm3, %v731_v30 }
 0x4fc   : > { %1231 = vmatpush3.bf16.xpose.msra.mxu1 %v850_v31  ;;  %1232 = vmatprep.mubr.msk.bf16.mxu1 %vm1425_vm1, %v1424_v10 }
 0x4fd   : > { %1242 = vmatprep.subr.bf16.mxu1 %v1424_v10 }
 0x503   : > { %1233 = vmatmul.mubr.msk.bf16.vlgmr.msra.gmra.mrb[12].mxu1 %vm606_vm2, %v843_v32 }
 0x504   : > { %1246 = vmatprep.mubr.msk.bf16.mxu1 %vm1425_vm1, %v1424_v10  ;;  %1243 = vmatpush3.bf16.msra.mxu1 %v984_v15 }
 0x505   : > { %1244 = vmatprep.subr.bf16.mxu1 %v1424_v10 }
 0x5cb   : > { %v836_v33 = vpop.f32.mrb[12].mxu0 }
 0x5cc   : > { %v1228_v34 = vpop.f32.mrb[13].mxu0  ;;  %v892_v35 = vsel %vm705_vm3, %v836_v33, -inf }
 0x5cd   : > { %893 = vmax.xlane.f32.xlu1 %v892_v35  ;;  %v839_v36 = vpop.f32.mrb[14].mxu0 }
 0x5ce   : > { %v1710_v37 = vpop.f32.mrb[8].mxu1  ;;  %v1229_v38 = vpop.f32.mrb[15].mxu0 }
 0x5cf   : > { %v1222_v39 = vpop.f32.mrb[9].mxu1 }
 0x5d0   : > { %v772_v40 = vpop.f32.mrb[10].mxu1 }
 0x5d1   : > { %v1223_v41 = vpop.f32.mrb[11].mxu1 }
 0x5d6   : > { %v886_v42 = vpop.f32.mrb[12].mxu1 }
 0x5d7   : > { %v1234_v43 = vpop.f32.mrb[13].mxu1  ;;  %v903_v44 = vsel %vm705_vm3, %v886_v42, -inf }
 0x5d8   : > { %904 = vmax.xlane.f32.xlu0 %v903_v44  ;;  %v889_v45 = vpop.f32.mrb[14].mxu1 }
 0x5d9   : > { %v1235_v46 = vpop.f32.mrb[15].mxu1 }
 0x65a   : > { %v894_v47 = vpop.xlane.xlu1 %893 }
 0x65b   : > { %v895_v48 = vsub.f32 %v836_v33, %v894_v47 }
 0x65d   : > { %v896_v49 = vmul.f32 1.442695, %v895_v48 }
 0x65f   : > { %1307 = vpow2.f32 %v896_v49 }
 0x665   : > { %v905_v50 = vpop.xlane.xlu0 %904 }
 0x666   : > { %v906_v51 = vsub.f32 %v886_v42, %v905_v50 }
 0x668   : > { %v907_v52 = vmul.f32 1.442695, %v906_v51 }
 0x669   : > { %v1308_v53 = vpop.eup %1307 }
 0x66a   : > { %1309 = vpow2.f32 %v907_v52  ;;  %v898_v54 = vsel %vm705_vm3, %v1308_v53, 0.0 }
 0x66b   : > { %899 = vadd.xlane.f32.xlu0 %v898_v54 }
 0x674   : > { %v1310_v55 = vpop.eup %1309 }
 0x675   : > { %v909_v57 = vsel %vm705_vm3, %v1310_v55, 0.0 }
 0x676   : > { %910 = vadd.xlane.f32.xlu0 %v909_v57 }
 0x68c   : > { %918 = vrot.lane.b32.xlu0 %v1678_v56, %s1428_s25  ;;  %v775_v56 = vmul.f32 %v1710_v37, %v1710_v37 }
 0x68e   : > { %v776_v12 = vsel %vm705_vm3, %v775_v56, 0.0 }
 0x6f8   : > { %v900_v58 = vpop.xlane.xlu0 %899 }
 0x6f9   : > { %1311 = vrcp.f32 %v900_v58 }
 0x703   : > { %v911_v59 = vpop.xlane.xlu0 %910  ;;  %v1312_v61 = vpop.eup %1311 }
 0x704   : > { %1313 = vrcp.f32 %v911_v59  ;;  %v902_v1 = vmul.f32 %v1312_v61, %v1308_v53 }
 0x707   : > { %v919_v60 = vpop.permute.xlu0 %918 }
 0x708   : > { %1237 = vmatpush3.bf16.msra.mxu0 %v919_v60 }
 0x70e   : > { %v1314_v62 = vpop.eup %1313 }
 0x70f   : > { %v913_v63 = vmul.f32 %v1314_v62, %v1310_v55 }
 0x711   : > { %v914_v2 = vmul.f32 %v913_v63, %v728_v24  ;;  %v985_v24 = vpack.c.bf16 %v983_v23, %v982_v22 }
 0x713   : > { %v915_v3 = vsub.f32 %v902_v1, %v914_v2  ;;  %1245 = vmatpush3.bf16.msra.mxu1 %v985_v24 }
 0x715   : > { %v916_v4 = vpack.c.bf16 %v915_v3, %v915_v3 }
 0x717   : > { %1239 = vmatmul.mubr.msk.bf16.vlgmr.msra.gmra.mrb[16].mxu0 %vm705_vm3, %v916_v4 }
 0x7ea   : > { %v958_v5 = vpop.f32.mrb[16].mxu0 }
 0x7eb   : > { %v964_v6 = vmul.f32 %v958_v5, %v958_v5  ;;  %v1240_v7 = vpop.f32.mrb[17].mxu0 }
 0x7ec   : > { %v961_v8 = vpop.f32.mrb[18].mxu0 }
 0x7ed   : > { %v1241_v9 = vpop.f32.mrb[19].mxu0  ;;  %v965_v11 = vsel %vm705_vm3, %v964_v6, 0.0 }
 0x7ee   : > { %966 = vadd.xlane.f32.xlu1 %v965_v11 }
 0x7f2   : > { %777 = vadd.xlane.f32.xlu1 %v776_v12 }
 0x87b   : > { %v967_v16 = vpop.xlane.xlu1 %966 }
 0x87c   : > { %v968_v17 = vmul.f32 0.0625, %v967_v16 }
 0x87e   : > { %v969_v18 = vadd.f32 1e-05, %v968_v17 }
 0x87f   : > { %v778_v19 = vpop.xlane.xlu1 %777 }
 0x880   : > { %1315 = vrsqrt.f32 %v969_v18  ;;  %v780_v20 = vmul.f32 0.0625, %v778_v19 }
 0x882   : > { %v781_v21 = vadd.f32 1e-05, %v780_v20 }
 0x884   : > { %1317 = vrsqrt.f32 %v781_v21 }
 0x88a   : > { %v1316_v25 = vpop.eup %1315 }
 0x88b   : > { %v971_v27 = vmul.f32 %v1316_v25, %v958_v5 }
 0x88d   : > { %v972_v28 = vmul.f32 %v1150_v26, %v971_v27 }
 0x88e   : > { %v1318_v29 = vpop.eup %1317 }
 0x88f   : > { %974 = vrot.lane.b32.xlu1 %v972_v28, %s1429_s27  ;;  %v783_v10 = vmul.f32 %v1318_v29, %v1710_v37 }
 0x891   : > { %v791_v30 = vmul.f32 %v1150_v26, %v783_v10 }
 0x901   : > { %v975_v31 = vpop.permute.xlu1 %974 }
 0x902   : > { %v977_v32 = vsel %vm705_vm3, %v791_v30, %v975_v31 }
 0x903   : > { %v978_v33 = vmul.f32 0.64449096, %v977_v32 }
 0x905   : > { %v979_v34 = vpack.c.bf16 %v978_v33, %v978_v33 }
 0x907   : > { %1247 = vmatmul.mubr.msk.bf16.vlgmr.msra.gmra.mrb[16].mxu1 %vm420_vm0, %v979_v34 }
 0x9da   : > { %v1023_v35 = vpop.f32.mrb[16].mxu1 }
 0x9db   : > { %v1029_v36 = vadd.f32 %v1023_v35, %v1606_v0  ;;  %v1248_v38 = vpop.f32.mrb[17].mxu1 }
 0x9dc   : > { %v1026_v39 = vpop.f32.mrb[18].mxu1 }
 0x9dd   : > { %1030 = vst.msk [vmem:[%s417_s14] sm:$0xff] %vm420_vm0, %v1029_v36  ;;  %v1249_v37 = vpop.f32.mrb[19].mxu1 }
 0x9de PF: > { %s23_s15 = sadd.s32 1, %s1417_s15  }
 0x9df   : > { %p20_p5 = scmp.ge.s32.totalorder %s23_s15, 4  }
 0x9e1   :  { %22 = sbr.rel (!%p20_p5) target bundleno = 4 (0x4), region = 106 }
 0x9e8   :  { %1050 = vsyncpa [#allocation4], 1 }
 0x9e9   :  { %1052 = vsyncpa [#allocation4 + $0x1], 1 }
 0x9ea   :  { %1053 = vsyncpa [#allocation6], 1 }

</bundles_post_ra>
